<compile_context>
chip_gen: v5e
topology: v5e:2x2
jax: 0.10.0
libtpu: 0.0.40
codegen_flags: <defaults>
</compile_context>

<pallas_src>
import functools

import jax
import jax.numpy as jnp
from jax.experimental import pallas as pl
from jax.experimental.pallas import tpu as pltpu


# ----------------------------------------------------------------------------
# In-kernel helpers (operate on VMEM-resident values)
# ----------------------------------------------------------------------------
def _pad_length(y, pad):
    """Zero-pad (Bb, L, C) -> (Bb, L + 2*pad, C) along the length (sublane) axis."""
    z = jnp.zeros((y.shape[0], pad, y.shape[2]), y.dtype)
    return jnp.concatenate([z, y, z], axis=1)


def _im2col(y_pad, ksize, dilation, out_len):
    """Gather dilated taps: (Bb, Lp, C) -> (Bb, out_len, ksize*C), taps along lanes."""
    taps = [y_pad[:, t * dilation:t * dilation + out_len, :] for t in range(ksize)]
    return jnp.concatenate(taps, axis=-1)


# ----------------------------------------------------------------------------
# Fused kernel
# ----------------------------------------------------------------------------
def _fcn_fused_kernel(x_ref, w1_ref, b1_ref, w2_ref, b2_ref, w3_ref, b3_ref,
                      pw1_ref, pb1_ref, pw2_ref, pb2_ref,
                      out_ref, h_ref, *, bb, seq_len, n_in):
    """Whole FCN forward for one batch block (bb rows); every intermediate in VMEM.

    x_ref  : (bb, L, Cin)  raw activations (f32)
    w1_ref : (7, Cin, 128) BN-folded conv1 weight (bf16), one (Cin,128) slab per tap
    w2_ref : (5*128, 256)  BN-folded conv2 weight (bf16), matmul-ready
    w3_ref : (3*256, 128)  BN-folded conv3 weight (bf16), matmul-ready
    pw*_ref: (128, 128)    BN-folded projection-head weights (bf16)
    b*_ref : (1, Cout)     folded biases (f32)
    out_ref: (bb, 128)     projection-head output
    h_ref  : (bb, 128)     pooled encoder features
    """
    L = seq_len
    f32 = jnp.float32
    bf16 = jnp.bfloat16

    # -- layer 1: kernel=7, dilation=2, pad=6.  Raw x -> pad in VMEM -> per-tap MXU
    #    accumulation (contraction Cin per tap).  Tiny FLOPs; avoids both a wrapper
    #    patch slab in HBM and a lane-unaligned 7*Cin-wide concat in VMEM.
    x = x_ref[...].astype(bf16)                                   # (bb, L, Cin)
    xp = _pad_length(x, 6)                                        # (bb, L+12, Cin)
    acc1 = jnp.dot(xp[:, 0:L, :].reshape(bb * L, n_in), w1_ref[0],
                   preferred_element_type=f32)
    for t in range(1, 7):
        tap = xp[:, t * 2:t * 2 + L, :].reshape(bb * L, n_in)
        acc1 = acc1 + jnp.dot(tap, w1_ref[t], preferred_element_type=f32)
    y1 = jnp.maximum(acc1 + b1_ref[...], 0.0).astype(bf16)        # (bb*L, 128) bf16

    # -- layer 2: kernel=5, dilation=4, pad=8.  bf16 pad + bf16 im2col ->
    #    ONE deep-contraction matmul (K = 640).
    y1p = _pad_length(y1.reshape(bb, L, 128), 8)                  # (bb, L+16, 128) bf16
    p2 = _im2col(y1p, 5, 4, L).reshape(bb * L, 5 * 128)           # bf16
    y2 = jnp.dot(p2, w2_ref[...], preferred_element_type=f32)
    y2 = jnp.maximum(y2 + b2_ref[...], 0.0).astype(bf16)          # (bb*L, 256) bf16

    # -- layer 3: kernel=3, dilation=8, pad=8.  Same, K = 768.
    y2p = _pad_length(y2.reshape(bb, L, 256), 8)                  # (bb, L+16, 256) bf16
    p3 = _im2col(y2p, 3, 8, L).reshape(bb * L, 3 * 256)           # bf16
    y3 = jnp.dot(p3, w3_ref[...], preferred_element_type=f32)
    y3 = jnp.maximum(y3 + b3_ref[...], 0.0)                       # (bb*L, 128) f32

    # -- AdaptiveAvgPool1d(1) + Flatten ---------------------------------------
    h = jnp.mean(y3.reshape(bb, L, 128), axis=1)                  # (bb, 128) f32
    h_ref[...] = h

    # -- projection head (h already resident in VMEM) -------------------------
    z = jnp.dot(h.astype(bf16), pw1_ref[...], preferred_element_type=f32)
    z = jnp.maximum(z + pb1_ref[...], 0.0)
    out = jnp.dot(z.astype(bf16), pw2_ref[...], preferred_element_type=f32)
    out_ref[...] = out + pb2_ref[...]


# ----------------------------------------------------------------------------
# Block-size selection & VMEM budgeting
# ----------------------------------------------------------------------------
_VMEM_BLOCK_BUDGET = 24 * 1024 * 1024   # per-block working-set target (v7x-safe)


def _block_vmem_bytes(bb, L, n_in):
    """Rough per-block VMEM working set in bytes (double-buffered I/O + live values)."""
    rows = bb * L
    x_io = 2 * rows * n_in * 4                                # blocked input, 2 buffers
    pads = bb * ((L + 12) * n_in + (L + 16) * (128 + 256)) * 2
    acts = rows * (128 * 4 + 128 * 2                           # conv1 acc + bf16 y1
                   + 640 * 2 + 256 * 4 + 256 * 2               # p2 slab, conv2 acc, bf16 y2
                   + 768 * 2 + 128 * 4)                        # p3 slab, conv3 acc
    weights = 2 * 2 * (7 * n_in * 128 + 640 * 256 + 768 * 128 + 2 * 128 * 128)
    out_io = 2 * 2 * bb * 128 * 4
    return x_io + pads + acts + weights + out_io


def _pick_batch_block(B, L, n_in):
    """Choose the per-grid-step batch block.

    Targets (perf review): bb*L >= ~512 rows so 256-wide MXU M-passes are full and
    the ~0.35us/step pipeline overhead is amortized; >= 2 grid steps when the problem
    is large enough so dimension_semantics=("parallel",) can put blocks on both v7x
    TensorCores; per-block working set inside a v7x-safe VMEM budget; blocks stay
    8-row aligned whenever the grid has more than one step.
    """
    bb = B
    while bb > 8 and _block_vmem_bytes(bb, L, n_in) > _VMEM_BLOCK_BUDGET:
        bb = max(8, (bb + 1) // 2)
    if bb == B and B >= 16 and (B // 2) * L >= 512:
        bb = B // 2                                            # >= 8, enables megacore
    if bb < B:
        bb = max(8, (bb // 8) * 8)
    return max(1, min(bb, B))


# ----------------------------------------------------------------------------
# Wrapper
# ----------------------------------------------------------------------------
def fcn_forward(x_ncw, p, batch_block=None):
    """x_ncw: (B, n_in, L) — PyTorch NCW layout.  Returns (out, h), each (B, 128)."""
    B, n_in, L = x_ncw.shape
    x = jnp.transpose(x_ncw, (0, 2, 1))                        # (B, L, Cin), raw f32

    bb = batch_block if batch_block is not None else _pick_batch_block(B, L, n_in)
    bb = max(1, min(bb, B))
    n_blocks = pl.cdiv(B, bb)
    b_pad = n_blocks * bb
    if b_pad != B:                                             # never rely on OOB block reads
        x = jnp.concatenate([x, jnp.zeros((b_pad - B, L, n_in), x.dtype)], axis=0)

    # Fold BN scale into weights; conv2/conv3 flattened to matmul-ready (K*Cin, Cout).
    bf16 = jnp.bfloat16
    w1 = (p['w1'] * p['s1'][None, None, :]).astype(bf16)                      # (7,Cin,128)
    w2 = (p['w2'] * p['s2'][None, None, :]).reshape(5 * 128, 256).astype(bf16)
    w3 = (p['w3'] * p['s3'][None, None, :]).reshape(3 * 256, 128).astype(bf16)
    pw1 = (p['pw1'] * p['ps1'][None, :]).astype(bf16)
    pw2 = p['pw2'].astype(bf16)
    b1 = p['b1'].reshape(1, 128)
    b2 = p['b2'].reshape(1, 256)
    b3 = p['b3'].reshape(1, 128)
    pb1 = p['pb1'].reshape(1, 128)
    pb2 = p['pb2'].reshape(1, 128)

    # Scoped-VMEM limit from the per-block working set (defaults are 16 MiB on v5e,
    # 32 MiB on v6e/v7x); capped at 56 MiB so it stays legal on v7x's 64 MiB VMEM.
    est = _block_vmem_bytes(bb, L, n_in)
    vmem_limit = int(min(max(2 * est, 32 * 1024 * 1024), 56 * 1024 * 1024))

    # Advisory cost estimate so XLA schedules the custom call correctly.
    conv_flops_per_row = 2 * (7 * n_in * 128 + 5 * 128 * 256 + 3 * 256 * 128)
    head_flops_per_row = 2 * (128 * 128 + 128 * 128)
    flops = b_pad * (L * conv_flops_per_row + head_flops_per_row)
    bytes_accessed = (x.size * 4
                      + 2 * (w1.size + w2.size + w3.size + pw1.size + pw2.size)
                      + 4 * (b1.size + b2.size + b3.size + pb1.size + pb2.size)
                      + 4 * 2 * b_pad * 128)
    cost = pl.CostEstimate(flops=int(flops), transcendentals=0,
                           bytes_accessed=int(bytes_accessed))

    kern = functools.partial(_fcn_fused_kernel, bb=bb, seq_len=L, n_in=n_in)
    const2 = lambda b: (0, 0)
    const3 = lambda b: (0, 0, 0)

    out, h = pl.pallas_call(
        kern,
        out_shape=(jax.ShapeDtypeStruct((b_pad, 128), jnp.float32),
                   jax.ShapeDtypeStruct((b_pad, 128), jnp.float32)),
        grid=(n_blocks,),
        in_specs=[
            pl.BlockSpec((bb, L, n_in), lambda b: (b, 0, 0)),   # raw activations per block
            pl.BlockSpec((7, n_in, 128), const3),               # weights stay resident
            pl.BlockSpec((1, 128), const2),
            pl.BlockSpec((5 * 128, 256), const2),
            pl.BlockSpec((1, 256), const2),
            pl.BlockSpec((3 * 256, 128), const2),
            pl.BlockSpec((1, 128), const2),
            pl.BlockSpec((128, 128), const2),
            pl.BlockSpec((1, 128), const2),
            pl.BlockSpec((128, 128), const2),
            pl.BlockSpec((1, 128), const2),
        ],
        out_specs=(pl.BlockSpec((bb, 128), lambda b: (b, 0)),
                   pl.BlockSpec((bb, 128), lambda b: (b, 0))),
        compiler_params=pltpu.CompilerParams(
            dimension_semantics=("parallel",),
            vmem_limit_bytes=vmem_limit),
        cost_estimate=cost,
    )(x, w1, b1, w2, b2, w3, b3, pw1, pb1, pw2, pb2)

    if b_pad != B:
        out = out[:B]
        h = h[:B]
    return out, h


# ----------------------------------------------------------------------------
# Deterministic parameter construction (eval-mode BN folded into scale/bias)
# ----------------------------------------------------------------------------
def _fold_bn(lin_bias, gamma, beta, mean, var, eps=1e-5):
    scale = gamma / jnp.sqrt(var + eps)
    bias = beta + (lin_bias - mean) * scale
    return scale, bias


def init_params(key, n_in):
    ks = iter(jax.random.split(key, 32))

    def nrm(shape, s=0.05):
        return s * jax.random.normal(next(ks), shape, jnp.float32)

    def conv_block(k, cin, cout):
        w = nrm((k, cin, cout), s=0.1)                    # (K, Cin, Cout)
        conv_b = nrm((cout,))
        gamma = 1.0 + nrm((cout,))
        beta = nrm((cout,))
        r_mean = nrm((cout,))
        r_var = 1.0 + jnp.abs(nrm((cout,)))
        s, b = _fold_bn(conv_b, gamma, beta, r_mean, r_var)
        return w, s, b

    p = {}
    p['w1'], p['s1'], p['b1'] = conv_block(7, n_in, 128)
    p['w2'], p['s2'], p['b2'] = conv_block(5, 128, 256)
    p['w3'], p['s3'], p['b3'] = conv_block(3, 256, 128)

    # proj head: Linear(128,128) + BN + ReLU + Linear(128,128)
    p['pw1'] = nrm((128, 128), s=0.1)                     # stored as (in, out)
    lin_b1 = nrm((128,))
    gamma = 1.0 + nrm((128,))
    beta = nrm((128,))
    r_mean = nrm((128,))
    r_var = 1.0 + jnp.abs(nrm((128,)))
    p['ps1'], p['pb1'] = _fold_bn(lin_b1, gamma, beta, r_mean, r_var)
    p['pw2'] = nrm((128, 128), s=0.1)
    p['pb2'] = nrm((128,))
    return p


# ----------------------------------------------------------------------------
# Pure-JAX f32 reference for a correctness sanity check
# ----------------------------------------------------------------------------
def fcn_reference(x_ncw, p):
    def conv(x, w, dil, pad):
        wt = jnp.transpose(w, (2, 1, 0))   # (K,Cin,Cout) -> (Cout,Cin,K)
        return jax.lax.conv_general_dilated(
            x, wt, window_strides=(1,), padding=[(pad, pad)],
            rhs_dilation=(dil,), dimension_numbers=('NCH', 'OIH', 'NCH'))

    def bn_relu(y, s, b):
        return jnp.maximum(y * s[None, :, None] + b[None, :, None], 0.0)

    y = bn_relu(conv(x_ncw, p['w1'], 2, 6), p['s1'], p['b1'])
    y = bn_relu(conv(y, p['w2'], 4, 8), p['s2'], p['b2'])
    y = bn_relu(conv(y, p['w3'], 8, 8), p['s3'], p['b3'])
    h = jnp.mean(y, axis=2)
    z = jnp.maximum((h @ p['pw1']) * p['ps1'] + p['pb1'], 0.0)
    out = z @ p['pw2'] + p['pb2']
    return out, h


# ----------------------------------------------------------------------------
if __name__ == "__main__":
    key = jax.random.PRNGKey(0)
    kx, kp = jax.random.split(key)

    B, n_in, L = 2, 4, 16
    x = jax.random.normal(kx, (B, n_in, L), jnp.float32)   # PyTorch NCW input
    params = init_params(kp, n_in)

    out, h = jax.block_until_ready(jax.jit(fcn_forward)(x, params))

    assert out.shape == (B, 128) and h.shape == (B, 128)
    assert out.dtype == jnp.float32 and h.dtype == jnp.float32

    # Reference is full f32; kernel uses bf16 MXU operands with f32 accumulation,
    # so allow a bf16-level tolerance.
    out_ref, h_ref = fcn_reference(x, params)
    assert jnp.allclose(h, h_ref, atol=5e-2, rtol=5e-2), "h mismatch vs reference"
    assert jnp.allclose(out, out_ref, atol=5e-2, rtol=5e-2), "out mismatch vs reference"

    print("KERNEL_OK")
</pallas_src>

<mosaic_0001>
module attributes {stable_mosaic.version = 11 : i64} {
  func.func @_fcn_fused_kernel(%arg0: i32, %arg1: memref<2x16x4xf32, #tpu.memory_space<vmem>>, %arg2: memref<7x4x128xbf16, #tpu.memory_space<vmem>>, %arg3: memref<1x128xf32, #tpu.memory_space<vmem>>, %arg4: memref<640x256xbf16, #tpu.memory_space<vmem>>, %arg5: memref<1x256xf32, #tpu.memory_space<vmem>>, %arg6: memref<768x128xbf16, #tpu.memory_space<vmem>>, %arg7: memref<1x128xf32, #tpu.memory_space<vmem>>, %arg8: memref<128x128xbf16, #tpu.memory_space<vmem>>, %arg9: memref<1x128xf32, #tpu.memory_space<vmem>>, %arg10: memref<128x128xbf16, #tpu.memory_space<vmem>>, %arg11: memref<1x128xf32, #tpu.memory_space<vmem>>, %arg12: memref<2x128xf32, #tpu.memory_space<vmem>>, %arg13: memref<2x128xf32, #tpu.memory_space<vmem>>) attributes {dimension_semantics = [#tpu.dimension_semantics<parallel>], iteration_bounds = array<i64: 1>, scalar_prefetch = 0 : i64, scratch_operands = 0 : i64, tpu.core_type = #tpu.core_type<tc>, window_params = [{transform_indices = @transform_0, window_bounds = array<i64: 2, 16, 4>}, {pipeline_mode = #tpu.pipeline_mode<synchronous>, transform_indices = @transform_1, window_bounds = array<i64: 7, 4, 128>}, {pipeline_mode = #tpu.pipeline_mode<synchronous>, transform_indices = @transform_2, window_bounds = array<i64: 1, 128>}, {pipeline_mode = #tpu.pipeline_mode<synchronous>, transform_indices = @transform_3, window_bounds = array<i64: 640, 256>}, {pipeline_mode = #tpu.pipeline_mode<synchronous>, transform_indices = @transform_4, window_bounds = array<i64: 1, 256>}, {pipeline_mode = #tpu.pipeline_mode<synchronous>, transform_indices = @transform_5, window_bounds = array<i64: 768, 128>}, {pipeline_mode = #tpu.pipeline_mode<synchronous>, transform_indices = @transform_6, window_bounds = array<i64: 1, 128>}, {pipeline_mode = #tpu.pipeline_mode<synchronous>, transform_indices = @transform_7, window_bounds = array<i64: 128, 128>}, {pipeline_mode = #tpu.pipeline_mode<synchronous>, transform_indices = @transform_8, window_bounds = array<i64: 1, 128>}, {pipeline_mode = #tpu.pipeline_mode<synchronous>, transform_indices = @transform_9, window_bounds = array<i64: 128, 128>}, {pipeline_mode = #tpu.pipeline_mode<synchronous>, transform_indices = @transform_10, window_bounds = array<i64: 1, 128>}, {transform_indices = @transform_11, window_bounds = array<i64: 2, 128>}, {transform_indices = @transform_12, window_bounds = array<i64: 2, 128>}]} {
    %c0 = arith.constant 0 : index
    %c0_0 = arith.constant 0 : index
    %c0_1 = arith.constant 0 : index
    %0 = vector.load %arg1[%c0, %c0_0, %c0_1] : memref<2x16x4xf32, #tpu.memory_space<vmem>>, vector<2x16x4xf32>
    %1 = arith.truncf %0 : vector<2x16x4xf32> to vector<2x16x4xbf16>
    %cst = arith.constant 0.000000e+00 : bf16
    %2 = vector.broadcast %cst : bf16 to vector<2x6x4xbf16>
    %3 = tpu.concatenate %2, %1, %2 in 1 : vector<2x6x4xbf16>, vector<2x16x4xbf16>, vector<2x6x4xbf16> -> vector<2x28x4xbf16>
    %4 = vector.extract_strided_slice %3 {offsets = [0, 0, 0], sizes = [2, 16, 4], strides = [1, 1, 1]} : vector<2x28x4xbf16> to vector<2x16x4xbf16>
    %5 = vector.shape_cast %4 : vector<2x16x4xbf16> to vector<32x4xbf16>
    %c0_2 = arith.constant 0 : index
    %c0_3 = arith.constant 0 : index
    %c0_4 = arith.constant 0 : index
    %6 = vector.load %arg2[%c0_2, %c0_3, %c0_4] : memref<7x4x128xbf16, #tpu.memory_space<vmem>>, vector<1x4x128xbf16>
    %7 = vector.shape_cast %6 : vector<1x4x128xbf16> to vector<4x128xbf16>
    %cst_5 = arith.constant dense<0.000000e+00> : vector<32x128xf32>
    %8 = tpu.matmul %5, %7, %cst_5 {dimension_numbers = #tpu.dot_dimension_numbers<[1], [0], [0], [1], [0, 0, 1, 1], [], []>} : vector<32x4xbf16>, vector<4x128xbf16>, vector<32x128xf32> -> vector<32x128xf32>
    %9 = vector.extract_strided_slice %3 {offsets = [0, 2, 0], sizes = [2, 16, 4], strides = [1, 1, 1]} : vector<2x28x4xbf16> to vector<2x16x4xbf16>
    %10 = vector.shape_cast %9 : vector<2x16x4xbf16> to vector<32x4xbf16>
    %c1 = arith.constant 1 : index
    %c0_6 = arith.constant 0 : index
    %c0_7 = arith.constant 0 : index
    %11 = vector.load %arg2[%c1, %c0_6, %c0_7] : memref<7x4x128xbf16, #tpu.memory_space<vmem>>, vector<1x4x128xbf16>
    %12 = vector.shape_cast %11 : vector<1x4x128xbf16> to vector<4x128xbf16>
    %cst_8 = arith.constant dense<0.000000e+00> : vector<32x128xf32>
    %13 = tpu.matmul %10, %12, %cst_8 {dimension_numbers = #tpu.dot_dimension_numbers<[1], [0], [0], [1], [0, 0, 1, 1], [], []>} : vector<32x4xbf16>, vector<4x128xbf16>, vector<32x128xf32> -> vector<32x128xf32>
    %14 = arith.addf %8, %13 : vector<32x128xf32>
    %15 = vector.extract_strided_slice %3 {offsets = [0, 4, 0], sizes = [2, 16, 4], strides = [1, 1, 1]} : vector<2x28x4xbf16> to vector<2x16x4xbf16>
    %16 = vector.shape_cast %15 : vector<2x16x4xbf16> to vector<32x4xbf16>
    %c2 = arith.constant 2 : index
    %c0_9 = arith.constant 0 : index
    %c0_10 = arith.constant 0 : index
    %17 = vector.load %arg2[%c2, %c0_9, %c0_10] : memref<7x4x128xbf16, #tpu.memory_space<vmem>>, vector<1x4x128xbf16>
    %18 = vector.shape_cast %17 : vector<1x4x128xbf16> to vector<4x128xbf16>
    %cst_11 = arith.constant dense<0.000000e+00> : vector<32x128xf32>
    %19 = tpu.matmul %16, %18, %cst_11 {dimension_numbers = #tpu.dot_dimension_numbers<[1], [0], [0], [1], [0, 0, 1, 1], [], []>} : vector<32x4xbf16>, vector<4x128xbf16>, vector<32x128xf32> -> vector<32x128xf32>
    %20 = arith.addf %14, %19 : vector<32x128xf32>
    %21 = vector.extract_strided_slice %3 {offsets = [0, 6, 0], sizes = [2, 16, 4], strides = [1, 1, 1]} : vector<2x28x4xbf16> to vector<2x16x4xbf16>
    %22 = vector.shape_cast %21 : vector<2x16x4xbf16> to vector<32x4xbf16>
    %c3 = arith.constant 3 : index
    %c0_12 = arith.constant 0 : index
    %c0_13 = arith.constant 0 : index
    %23 = vector.load %arg2[%c3, %c0_12, %c0_13] : memref<7x4x128xbf16, #tpu.memory_space<vmem>>, vector<1x4x128xbf16>
    %24 = vector.shape_cast %23 : vector<1x4x128xbf16> to vector<4x128xbf16>
    %cst_14 = arith.constant dense<0.000000e+00> : vector<32x128xf32>
    %25 = tpu.matmul %22, %24, %cst_14 {dimension_numbers = #tpu.dot_dimension_numbers<[1], [0], [0], [1], [0, 0, 1, 1], [], []>} : vector<32x4xbf16>, vector<4x128xbf16>, vector<32x128xf32> -> vector<32x128xf32>
    %26 = arith.addf %20, %25 : vector<32x128xf32>
    %27 = vector.extract_strided_slice %3 {offsets = [0, 8, 0], sizes = [2, 16, 4], strides = [1, 1, 1]} : vector<2x28x4xbf16> to vector<2x16x4xbf16>
    %28 = vector.shape_cast %27 : vector<2x16x4xbf16> to vector<32x4xbf16>
    %c4 = arith.constant 4 : index
    %c0_15 = arith.constant 0 : index
    %c0_16 = arith.constant 0 : index
    %29 = vector.load %arg2[%c4, %c0_15, %c0_16] : memref<7x4x128xbf16, #tpu.memory_space<vmem>>, vector<1x4x128xbf16>
    %30 = vector.shape_cast %29 : vector<1x4x128xbf16> to vector<4x128xbf16>
    %cst_17 = arith.constant dense<0.000000e+00> : vector<32x128xf32>
    %31 = tpu.matmul %28, %30, %cst_17 {dimension_numbers = #tpu.dot_dimension_numbers<[1], [0], [0], [1], [0, 0, 1, 1], [], []>} : vector<32x4xbf16>, vector<4x128xbf16>, vector<32x128xf32> -> vector<32x128xf32>
    %32 = arith.addf %26, %31 : vector<32x128xf32>
    %33 = vector.extract_strided_slice %3 {offsets = [0, 10, 0], sizes = [2, 16, 4], strides = [1, 1, 1]} : vector<2x28x4xbf16> to vector<2x16x4xbf16>
    %34 = vector.shape_cast %33 : vector<2x16x4xbf16> to vector<32x4xbf16>
    %c5 = arith.constant 5 : index
    %c0_18 = arith.constant 0 : index
    %c0_19 = arith.constant 0 : index
    %35 = vector.load %arg2[%c5, %c0_18, %c0_19] : memref<7x4x128xbf16, #tpu.memory_space<vmem>>, vector<1x4x128xbf16>
    %36 = vector.shape_cast %35 : vector<1x4x128xbf16> to vector<4x128xbf16>
    %cst_20 = arith.constant dense<0.000000e+00> : vector<32x128xf32>
    %37 = tpu.matmul %34, %36, %cst_20 {dimension_numbers = #tpu.dot_dimension_numbers<[1], [0], [0], [1], [0, 0, 1, 1], [], []>} : vector<32x4xbf16>, vector<4x128xbf16>, vector<32x128xf32> -> vector<32x128xf32>
    %38 = arith.addf %32, %37 : vector<32x128xf32>
    %39 = vector.extract_strided_slice %3 {offsets = [0, 12, 0], sizes = [2, 16, 4], strides = [1, 1, 1]} : vector<2x28x4xbf16> to vector<2x16x4xbf16>
    %40 = vector.shape_cast %39 : vector<2x16x4xbf16> to vector<32x4xbf16>
    %c6 = arith.constant 6 : index
    %c0_21 = arith.constant 0 : index
    %c0_22 = arith.constant 0 : index
    %41 = vector.load %arg2[%c6, %c0_21, %c0_22] : memref<7x4x128xbf16, #tpu.memory_space<vmem>>, vector<1x4x128xbf16>
    %42 = vector.shape_cast %41 : vector<1x4x128xbf16> to vector<4x128xbf16>
    %cst_23 = arith.constant dense<0.000000e+00> : vector<32x128xf32>
    %43 = tpu.matmul %40, %42, %cst_23 {dimension_numbers = #tpu.dot_dimension_numbers<[1], [0], [0], [1], [0, 0, 1, 1], [], []>} : vector<32x4xbf16>, vector<4x128xbf16>, vector<32x128xf32> -> vector<32x128xf32>
    %44 = arith.addf %38, %43 : vector<32x128xf32>
    %c0_24 = arith.constant 0 : index
    %c0_25 = arith.constant 0 : index
    %45 = vector.load %arg3[%c0_24, %c0_25] : memref<1x128xf32, #tpu.memory_space<vmem>>, vector<1x128xf32>
    %46 = vector.broadcast %45 : vector<1x128xf32> to vector<32x128xf32>
    %47 = arith.addf %44, %46 : vector<32x128xf32>
    %cst_26 = arith.constant 0.000000e+00 : f32
    %48 = vector.broadcast %cst_26 : f32 to vector<32x128xf32>
    %49 = arith.maximumf %47, %48 : vector<32x128xf32>
    %50 = arith.truncf %49 : vector<32x128xf32> to vector<32x128xbf16>
    %51 = vector.shape_cast %50 : vector<32x128xbf16> to vector<2x16x128xbf16>
    %cst_27 = arith.constant 0.000000e+00 : bf16
    %52 = vector.broadcast %cst_27 : bf16 to vector<2x8x128xbf16>
    %53 = tpu.concatenate %52, %51, %52 in 1 : vector<2x8x128xbf16>, vector<2x16x128xbf16>, vector<2x8x128xbf16> -> vector<2x32x128xbf16>
    %54 = vector.extract_strided_slice %53 {offsets = [0, 0, 0], sizes = [2, 16, 128], strides = [1, 1, 1]} : vector<2x32x128xbf16> to vector<2x16x128xbf16>
    %55 = vector.extract_strided_slice %53 {offsets = [0, 4, 0], sizes = [2, 16, 128], strides = [1, 1, 1]} : vector<2x32x128xbf16> to vector<2x16x128xbf16>
    %56 = vector.extract_strided_slice %53 {offsets = [0, 8, 0], sizes = [2, 16, 128], strides = [1, 1, 1]} : vector<2x32x128xbf16> to vector<2x16x128xbf16>
    %57 = vector.extract_strided_slice %53 {offsets = [0, 12, 0], sizes = [2, 16, 128], strides = [1, 1, 1]} : vector<2x32x128xbf16> to vector<2x16x128xbf16>
    %58 = vector.extract_strided_slice %53 {offsets = [0, 16, 0], sizes = [2, 16, 128], strides = [1, 1, 1]} : vector<2x32x128xbf16> to vector<2x16x128xbf16>
    %59 = tpu.concatenate %54, %55, %56, %57, %58 in 2 : vector<2x16x128xbf16>, vector<2x16x128xbf16>, vector<2x16x128xbf16>, vector<2x16x128xbf16>, vector<2x16x128xbf16> -> vector<2x16x640xbf16>
    %60 = vector.shape_cast %59 : vector<2x16x640xbf16> to vector<32x640xbf16>
    %c0_28 = arith.constant 0 : index
    %c0_29 = arith.constant 0 : index
    %61 = vector.load %arg4[%c0_28, %c0_29] : memref<640x256xbf16, #tpu.memory_space<vmem>>, vector<640x256xbf16>
    %cst_30 = arith.constant dense<0.000000e+00> : vector<32x256xf32>
    %62 = tpu.matmul %60, %61, %cst_30 {dimension_numbers = #tpu.dot_dimension_numbers<[1], [0], [0], [1], [0, 0, 1, 1], [], []>} : vector<32x640xbf16>, vector<640x256xbf16>, vector<32x256xf32> -> vector<32x256xf32>
    %c0_31 = arith.constant 0 : index
    %c0_32 = arith.constant 0 : index
    %63 = vector.load %arg5[%c0_31, %c0_32] : memref<1x256xf32, #tpu.memory_space<vmem>>, vector<1x256xf32>
    %64 = vector.broadcast %63 : vector<1x256xf32> to vector<32x256xf32>
    %65 = arith.addf %62, %64 : vector<32x256xf32>
    %cst_33 = arith.constant 0.000000e+00 : f32
    %66 = vector.broadcast %cst_33 : f32 to vector<32x256xf32>
    %67 = arith.maximumf %65, %66 : vector<32x256xf32>
    %68 = arith.truncf %67 : vector<32x256xf32> to vector<32x256xbf16>
    %69 = vector.shape_cast %68 : vector<32x256xbf16> to vector<2x16x256xbf16>
    %cst_34 = arith.constant 0.000000e+00 : bf16
    %70 = vector.broadcast %cst_34 : bf16 to vector<2x8x256xbf16>
    %71 = tpu.concatenate %70, %69, %70 in 1 : vector<2x8x256xbf16>, vector<2x16x256xbf16>, vector<2x8x256xbf16> -> vector<2x32x256xbf16>
    %72 = vector.extract_strided_slice %71 {offsets = [0, 0, 0], sizes = [2, 16, 256], strides = [1, 1, 1]} : vector<2x32x256xbf16> to vector<2x16x256xbf16>
    %73 = vector.extract_strided_slice %71 {offsets = [0, 8, 0], sizes = [2, 16, 256], strides = [1, 1, 1]} : vector<2x32x256xbf16> to vector<2x16x256xbf16>
    %74 = vector.extract_strided_slice %71 {offsets = [0, 16, 0], sizes = [2, 16, 256], strides = [1, 1, 1]} : vector<2x32x256xbf16> to vector<2x16x256xbf16>
    %75 = tpu.concatenate %72, %73, %74 in 2 : vector<2x16x256xbf16>, vector<2x16x256xbf16>, vector<2x16x256xbf16> -> vector<2x16x768xbf16>
    %76 = vector.shape_cast %75 : vector<2x16x768xbf16> to vector<32x768xbf16>
    %c0_35 = arith.constant 0 : index
    %c0_36 = arith.constant 0 : index
    %77 = vector.load %arg6[%c0_35, %c0_36] : memref<768x128xbf16, #tpu.memory_space<vmem>>, vector<768x128xbf16>
    %cst_37 = arith.constant dense<0.000000e+00> : vector<32x128xf32>
    %78 = tpu.matmul %76, %77, %cst_37 {dimension_numbers = #tpu.dot_dimension_numbers<[1], [0], [0], [1], [0, 0, 1, 1], [], []>} : vector<32x768xbf16>, vector<768x128xbf16>, vector<32x128xf32> -> vector<32x128xf32>
    %c0_38 = arith.constant 0 : index
    %c0_39 = arith.constant 0 : index
    %79 = vector.load %arg7[%c0_38, %c0_39] : memref<1x128xf32, #tpu.memory_space<vmem>>, vector<1x128xf32>
    %80 = vector.broadcast %79 : vector<1x128xf32> to vector<32x128xf32>
    %81 = arith.addf %78, %80 : vector<32x128xf32>
    %cst_40 = arith.constant 0.000000e+00 : f32
    %82 = vector.broadcast %cst_40 : f32 to vector<32x128xf32>
    %83 = arith.maximumf %81, %82 : vector<32x128xf32>
    %84 = vector.shape_cast %83 : vector<32x128xf32> to vector<2x16x128xf32>
    %cst_41 = arith.constant dense<0.000000e+00> : vector<2x128xf32>
    %85 = vector.multi_reduction <add>, %84, %cst_41 [1] : vector<2x16x128xf32> to vector<2x128xf32>
    %cst_42 = arith.constant 1.600000e+01 : f32
    %86 = vector.broadcast %cst_42 : f32 to vector<2x128xf32>
    %87 = arith.divf %85, %86 : vector<2x128xf32>
    %c0_43 = arith.constant 0 : index
    %c0_44 = arith.constant 0 : index
    %88 = vector.load %arg13[%c0_43, %c0_44] : memref<2x128xf32, #tpu.memory_space<vmem>>, vector<2x128xf32>
    tpu.vector_store %arg13[%c0_43, %c0_44], %87 {strides = array<i32>} : memref<2x128xf32, #tpu.memory_space<vmem>>, vector<2x128xf32>,
    %89 = arith.truncf %87 : vector<2x128xf32> to vector<2x128xbf16>
    %c0_45 = arith.constant 0 : index
    %c0_46 = arith.constant 0 : index
    %90 = vector.load %arg8[%c0_45, %c0_46] : memref<128x128xbf16, #tpu.memory_space<vmem>>, vector<128x128xbf16>
    %cst_47 = arith.constant dense<0.000000e+00> : vector<2x128xf32>
    %91 = tpu.matmul %89, %90, %cst_47 {dimension_numbers = #tpu.dot_dimension_numbers<[1], [0], [0], [1], [0, 0, 1, 1], [], []>} : vector<2x128xbf16>, vector<128x128xbf16>, vector<2x128xf32> -> vector<2x128xf32>
    %c0_48 = arith.constant 0 : index
    %c0_49 = arith.constant 0 : index
    %92 = vector.load %arg9[%c0_48, %c0_49] : memref<1x128xf32, #tpu.memory_space<vmem>>, vector<1x128xf32>
    %93 = vector.broadcast %92 : vector<1x128xf32> to vector<2x128xf32>
    %94 = arith.addf %91, %93 : vector<2x128xf32>
    %cst_50 = arith.constant 0.000000e+00 : f32
    %95 = vector.broadcast %cst_50 : f32 to vector<2x128xf32>
    %96 = arith.maximumf %94, %95 : vector<2x128xf32>
    %97 = arith.truncf %96 : vector<2x128xf32> to vector<2x128xbf16>
    %c0_51 = arith.constant 0 : index
    %c0_52 = arith.constant 0 : index
    %98 = vector.load %arg10[%c0_51, %c0_52] : memref<128x128xbf16, #tpu.memory_space<vmem>>, vector<128x128xbf16>
    %cst_53 = arith.constant dense<0.000000e+00> : vector<2x128xf32>
    %99 = tpu.matmul %97, %98, %cst_53 {dimension_numbers = #tpu.dot_dimension_numbers<[1], [0], [0], [1], [0, 0, 1, 1], [], []>} : vector<2x128xbf16>, vector<128x128xbf16>, vector<2x128xf32> -> vector<2x128xf32>
    %c0_54 = arith.constant 0 : index
    %c0_55 = arith.constant 0 : index
    %100 = vector.load %arg11[%c0_54, %c0_55] : memref<1x128xf32, #tpu.memory_space<vmem>>, vector<1x128xf32>
    %101 = vector.broadcast %100 : vector<1x128xf32> to vector<2x128xf32>
    %102 = arith.addf %99, %101 : vector<2x128xf32>
    %c0_56 = arith.constant 0 : index
    %c0_57 = arith.constant 0 : index
    %103 = vector.load %arg12[%c0_56, %c0_57] : memref<2x128xf32, #tpu.memory_space<vmem>>, vector<2x128xf32>
    tpu.vector_store %arg12[%c0_56, %c0_57], %102 {strides = array<i32>} : memref<2x128xf32, #tpu.memory_space<vmem>>, vector<2x128xf32>,
    return
  }
  func.func @transform_0(%arg0: i32) -> (i32, i32, i32) {
    %c0_i32 = arith.constant 0 : i32
    %c0_i32_0 = arith.constant 0 : i32
    %c0_i32_1 = arith.constant 0 : i32
    return %arg0, %c0_i32, %c0_i32_0 : i32, i32, i32
  }
  func.func @transform_1(%arg0: i32) -> (i32, i32, i32) {
    %c0_i32 = arith.constant 0 : i32
    %c0_i32_0 = arith.constant 0 : i32
    %c0_i32_1 = arith.constant 0 : i32
    %c0_i32_2 = arith.constant 0 : i32
    return %c0_i32, %c0_i32_0, %c0_i32_1 : i32, i32, i32
  }
  func.func @transform_2(%arg0: i32) -> (i32, i32) {
    %c0_i32 = arith.constant 0 : i32
    %c0_i32_0 = arith.constant 0 : i32
    %c0_i32_1 = arith.constant 0 : i32
    return %c0_i32, %c0_i32_0 : i32, i32
  }
  func.func @transform_3(%arg0: i32) -> (i32, i32) {
    %c0_i32 = arith.constant 0 : i32
    %c0_i32_0 = arith.constant 0 : i32
    %c0_i32_1 = arith.constant 0 : i32
    return %c0_i32, %c0_i32_0 : i32, i32
  }
  func.func @transform_4(%arg0: i32) -> (i32, i32) {
    %c0_i32 = arith.constant 0 : i32
    %c0_i32_0 = arith.constant 0 : i32
    %c0_i32_1 = arith.constant 0 : i32
    return %c0_i32, %c0_i32_0 : i32, i32
  }
  func.func @transform_5(%arg0: i32) -> (i32, i32) {
    %c0_i32 = arith.constant 0 : i32
    %c0_i32_0 = arith.constant 0 : i32
    %c0_i32_1 = arith.constant 0 : i32
    return %c0_i32, %c0_i32_0 : i32, i32
  }
  func.func @transform_6(%arg0: i32) -> (i32, i32) {
    %c0_i32 = arith.constant 0 : i32
    %c0_i32_0 = arith.constant 0 : i32
    %c0_i32_1 = arith.constant 0 : i32
    return %c0_i32, %c0_i32_0 : i32, i32
  }
  func.func @transform_7(%arg0: i32) -> (i32, i32) {
    %c0_i32 = arith.constant 0 : i32
    %c0_i32_0 = arith.constant 0 : i32
    %c0_i32_1 = arith.constant 0 : i32
    return %c0_i32, %c0_i32_0 : i32, i32
  }
  func.func @transform_8(%arg0: i32) -> (i32, i32) {
    %c0_i32 = arith.constant 0 : i32
    %c0_i32_0 = arith.constant 0 : i32
    %c0_i32_1 = arith.constant 0 : i32
    return %c0_i32, %c0_i32_0 : i32, i32
  }
  func.func @transform_9(%arg0: i32) -> (i32, i32) {
    %c0_i32 = arith.constant 0 : i32
    %c0_i32_0 = arith.constant 0 : i32
    %c0_i32_1 = arith.constant 0 : i32
    return %c0_i32, %c0_i32_0 : i32, i32
  }
  func.func @transform_10(%arg0: i32) -> (i32, i32) {
    %c0_i32 = arith.constant 0 : i32
    %c0_i32_0 = arith.constant 0 : i32
    %c0_i32_1 = arith.constant 0 : i32
    return %c0_i32, %c0_i32_0 : i32, i32
  }
  func.func @transform_11(%arg0: i32) -> (i32, i32) {
    %c0_i32 = arith.constant 0 : i32
    %c0_i32_0 = arith.constant 0 : i32
    return %arg0, %c0_i32 : i32, i32
  }
  func.func @transform_12(%arg0: i32) -> (i32, i32) {
    %c0_i32 = arith.constant 0 : i32
    %c0_i32_0 = arith.constant 0 : i32
    return %arg0, %c0_i32 : i32, i32
  }
}

</mosaic_0001>

<bundles_post_ra>
// kernel: fcn_forward.1
= control target key start
LH: loop header
LB: loop body
LE: loop exit
PB: predicated region body
PF: predicated region fallthrough
CT: control target
= control target key end

     0   :  { %18 = vsyncpa [#allocation3], 0  ;;  %vm92_vm0 = vcmask 1041408   ;;  %vm63_vm1 = vcmask 1042432   ;;  %s3770_s0 = inlined_call_operand.vmem [shape: f32[2,16,4], index: 0, kind: input, shape index: {}]   ;;  %s3771_s1 = inlined_call_operand.vmem [shape: bf16[7,4,128], index: 1, kind: input, shape index: {}]   ;;  %s3772_s2 = inlined_call_operand.vmem [shape: f32[1,128], index: 2, kind: input, shape index: {}]   ;;  %s3773_s3 = inlined_call_operand.vmem [shape: bf16[640,256], index: 3, kind: input, shape index: {}]   ;;  %s3774_s4 = inlined_call_operand.vmem [shape: f32[1,256], index: 4, kind: input, shape index: {}]   ;;  %s3775_s5 = inlined_call_operand.vmem [shape: bf16[768,128], index: 5, kind: input, shape index: {}]   ;;  %s3776_s6 = inlined_call_operand.vmem [shape: f32[1,128], index: 6, kind: input, shape index: {}]   ;;  %s3777_s7 = inlined_call_operand.vmem [shape: bf16[128,128], index: 7, kind: input, shape index: {}]   ;;  %s3778_s8 = inlined_call_operand.vmem [shape: f32[1,128], index: 8, kind: input, shape index: {}]   ;;  %s3779_s9 = inlined_call_operand.vmem [shape: bf16[128,128], index: 9, kind: input, shape index: {}]   ;;  %s3780_s10 = inlined_call_operand.vmem [shape: f32[1,128], index: 10, kind: input, shape index: {}]   ;;  %s3781_s11 = inlined_call_operand.hbm [shape: f32[2,128], index: 11, kind: output, shape index: {0}]   ;;  %s3782_s12 = inlined_call_operand.hbm [shape: f32[2,128], index: 12, kind: output, shape index: {1}]  }
   0x1   :  { %v71_v0 = vld [vmem:[%s3771_s1] sm:$0x3]  ;;  %v1912_v1 = vld [vmem:[%s3771_s1 + $0x2] sm:$0x3]  ;;  %v44_v5 = vld [vmem:[%s3770_s0 + $0x8] sm:$0xff] }
   0x2   :  { %v43_v2 = vld [vmem:[%s3770_s0] sm:$0xff]  ;;  %v120_v3 = vsel %vm92_vm0, %v71_v0, 0  ;;  %v94_v4 = vsel %vm92_vm0, %v1912_v1, 0  ;;  %v48_v8 = vpack.c.bf16 %v44_v5, %v44_v5  ;;  %v45_v10 = vld [vmem:[%s3770_s0 + $0x10] sm:$0xff]  ;;  %v46_v11 = vld [vmem:[%s3770_s0 + $0x18] sm:$0xff] }
   0x3   :  { %v47_v6 = vpack.c.bf16 %v43_v2, %v43_v2  ;;  %v1917_v7 = vld [vmem:[%s3771_s1 + $0x4] sm:$0x3]  ;;  %129 = vmatpush.bf16.msra.mxu1 %v120_v3  ;;  %103 = vmatpush.bf16.msra.mxu0 %v94_v4  ;;  %v49_v13 = vpack.c.bf16 %v45_v10, %v45_v10  ;;  %v50_v14 = vpack.c.bf16 %v46_v11, %v46_v11  ;;  %v1929_v15 = vld [vmem:[%s3771_s1 + $0xc] sm:$0x3]  ;;  %v1926_v16 = vld [vmem:[%s3771_s1 + $0xa] sm:$0x3] }
   0x4   :  { %v157_v9 = vsel %vm92_vm0, %v1917_v7, 0  ;;  %2676 = vmatpush.bf16.msra.mxu3 %v94_v4  ;;  %v56_v17 = vunpack.c.l.b16 %v48_v8  ;;  %v321_v18 = vsel %vm92_vm0, %v1929_v15, 0  ;;  %v280_v19 = vsel %vm92_vm0, %v1926_v16, 0  ;;  %v1920_v20 = vld [vmem:[%s3771_s1 + $0x6] sm:$0x3] }
   0x5   :  { %v55_v12 = vunpack.c.l.b16 %v47_v6  ;;  %166 = vmatpush.bf16.msra.mxu2 %v157_v9  ;;  %v57_v21 = vunpack.c.l.b16 %v49_v13  ;;  %v58_v22 = vunpack.c.l.b16 %v50_v14  ;;  %v198_v23 = vsel %vm92_vm0, %v1920_v20, 0  ;;  %v1923_v24 = vld [vmem:[%s3771_s1 + $0x8] sm:$0x3] }
   0x6   :  { %v239_v26 = vsel %vm92_vm0, %v1923_v24, 0 }
   0x7   :  { %289 = vmatpush.bf16.msrb.mxu1 %v280_v19  ;;  %v59_v25 = vpack.c.b16 %v56_v17, %v55_v12  ;;  %v60_v27 = vpack.c.b16 %v58_v22, %v57_v21  ;;  %248 = vmatpush.bf16.msrb.mxu0 %v239_v26 }
   0x8   :  { %207 = vmatpush.bf16.msrb.mxu3 %v198_v23 }
   0x9   :  { %330 = vmatpush.bf16.msrb.mxu2 %v321_v18 }
   0xa   :  { %19 = vsyncpa [#allocation5], 0  ;;  %v61_v28 = vrot.slane %v59_v25, 5  ;;  %vm85_vm2 = vcmask 31744   ;;  %v62_v29 = vrot.slane %v60_v27, 5  ;;  %vm76_vm3 = vcmask 1046528  }
   0xb   :  { %vm141_vm4 = vcmask 1045504   ;;  %vm223_vm5 = vcmask 1043456   ;;  %vm182_vm6 = vcmask 1044480   ;;  %v1990_v6 = vld [vmem:[%s3773_s3 + $0x70] sm:$0xf]  ;;  %vm1702_vm9 = vcmask 1041409  }
   0xc   :  { %v66_v30 = vsel %vm63_vm1, 0, %v61_v28  ;;  %v69_v31 = vsel %vm63_vm1, %v61_v28, 0  ;;  %v68_v34 = vsel %vm63_vm1, 0, %v62_v29  ;;  %v70_v35 = vsel %vm63_vm1, %v62_v29, 0  ;;  %v2547_v7 = vld [vmem:[%s3773_s3 + $0x74] sm:$0xf0]  ;;  %vm3238_vm7 = vmneg %vm223_vm5 }
   0xd   :  { %1915 = vmatmul.msk.bf16.vlgmr.msra.gmra.mxu1 %vm85_vm2, %v66_v30  ;;  %v77_v32 = vrot.slane %v66_v30, 1  ;;  %v78_v33 = vrot.slane %v69_v31, 1  ;;  %v80_v36 = vrot.slane %v68_v34, 1  ;;  %v81_v37 = vrot.slane %v70_v35, 1  ;;  %v1982_v9 = vld [vmem:[%s3773_s3 + $0x60] sm:$0xf] }
   0xe   :  { %v142_v38 = vrot.slane %v66_v30, 2  ;;  %v143_v39 = vrot.slane %v69_v31, 2  ;;  %v224_v43 = vrot.slane %v66_v30, 4  ;;  %v225_v44 = vrot.slane %v69_v31, 4  ;;  %v2545_v10 = vld [vmem:[%s3773_s3 + $0x64] sm:$0xf0] }
   0xf   :  { %v79_v40 = vsel %vm76_vm3, %v77_v32, %v78_v33  ;;  %v82_v41 = vsel %vm76_vm3, %v80_v36, %v81_v37  ;;  %v145_v45 = vrot.slane %v68_v34, 2  ;;  %v146_v46 = vrot.slane %v70_v35, 2  ;;  %v1974_v12 = vld [vmem:[%s3773_s3 + $0x50] sm:$0xf]  ;;  %v2543_v13 = vld [vmem:[%s3773_s3 + $0x54] sm:$0xf0] }
  0x10   :  { %1913 = vmatmul.msk.bf16.vlgmr.msra.gmra.mxu0 %vm85_vm2, %v79_v40  ;;  %v144_v42 = vsel %vm141_vm4, %v142_v38, %v143_v39  ;;  %1914 = vmatmul.msk.bf16.vlgmr.msra.gmra.mxu3 %vm85_vm2, %v82_v41  ;;  %v183_v47 = vrot.slane %v66_v30, 3  ;;  %v184_v48 = vrot.slane %v69_v31, 3  ;;  %v226_v49 = vsel %vm223_vm5, %v224_v43, %v225_v44  ;;  %v2054_v16 = vld [vmem:[%s3773_s3 + $0xf0] sm:$0xf]  ;;  %v2563_v17 = vld [vmem:[%s3773_s3 + $0xf4] sm:$0xf0] }
  0x11   :  { %1918 = vmatmul.msk.bf16.vlgmr.msra.gmra.mxu2 %vm85_vm2, %v144_v42  ;;  %v147_v50 = vsel %vm141_vm4, %v145_v45, %v146_v46  ;;  %v265_v52 = vrot.slane %v66_v30, 5  ;;  %v266_v53 = vrot.slane %v69_v31, 5  ;;  %v186_v54 = vrot.slane %v68_v34, 3  ;;  %v1966_v18 = vld [vmem:[%s3773_s3 + $0x40] sm:$0xf]  ;;  %s2739_s14 = smov [#allocation4]  }
  0x12   :  { %v185_v51 = vsel %vm182_vm6, %v183_v47, %v184_v48  ;;  %v227_v55 = vrot.slane %v68_v34, 4  ;;  %v228_v56 = vrot.slane %v70_v35, 4  ;;  %v187_v58 = vrot.slane %v70_v35, 3  ;;  %v2541_v20 = vld [vmem:[%s3773_s3 + $0x44] sm:$0xf0]  ;;  %s1896_s15 = sshll.u32 %s2739_s14, 4  ;;  %s1897_s15 = int_to_ptr.vmem [resolvable:$true] %s1896_s15 }
  0x13   :  { %v267_v57 = vsel %vm63_vm1, %v265_v52, %v266_v53  ;;  %v306_v59 = vrot.slane %v66_v30, 6  ;;  %v307_v60 = vrot.slane %v69_v31, 6  ;;  %v268_v0 = vrot.slane %v68_v34, 5  ;;  %v2118_v21 = vld [vmem:[%s3773_s3 + $0x170] sm:$0xf]  ;;  %s1898_s18 = sshll.u32 %s3782_s12, 4  ;;  %s1899_s18 = int_to_ptr.hbm [resolvable:$true] %s1898_s18 }
  0x14   :  { %v229_v61 = vsel %vm223_vm5, %v227_v55, %v228_v56  ;;  %v188_v62 = vsel %vm182_vm6, %v186_v54, %v187_v58  ;;  %v269_v1 = vrot.slane %v70_v35, 5  ;;  %v309_v3 = vrot.slane %v68_v34, 6  ;;  %v2579_v22 = vld [vmem:[%s3773_s3 + $0x174] sm:$0xf0]  ;;  %v2182_v25 = vld [vmem:[%s3773_s3 + $0x1f0] sm:$0xf] }
  0x15   :  { %v308_v63 = vsel %vm92_vm0, %v306_v59, %v307_v60  ;;  %v310_v4 = vrot.slane %v70_v35, 6  ;;  %v1991_v8 = vor.u32 %v2547_v7, %v1990_v6  ;;  %v1983_v11 = vor.u32 %v2545_v10, %v1982_v9  ;;  %v2595_v26 = vld [vmem:[%s3773_s3 + $0x1f4] sm:$0xf0]  ;;  %v2046_v28 = vld [vmem:[%s3773_s3 + $0xe0] sm:$0xf]  ;;  %s1887_s0 = sshll.u32 %s3781_s11, 4  ;;  %s1888_s0 = int_to_ptr.hbm [resolvable:$true] %s1887_s0 }
  0x16   :  { %v270_v2 = vsel %vm63_vm1, %v268_v0, %v269_v1  ;;  %v1975_v14 = vor.u32 %v2543_v13, %v1974_v12  ;;  %v2055_v19 = vor.u32 %v2563_v17, %v2054_v16  ;;  %v1967_v23 = vor.u32 %v2541_v20, %v1966_v18  ;;  %v2561_v29 = vld [vmem:[%s3773_s3 + $0xe4] sm:$0xf0]  ;;  %v1958_v30 = vld [vmem:[%s3773_s3 + $0x30] sm:$0xf]  ;;  %v2539_v32 = vld [vmem:[%s3773_s3 + $0x34] sm:$0xf0] }
  0x17   :  { %v311_v5 = vsel %vm92_vm0, %v309_v3, %v310_v4  ;;  %901 = vmatpush.bf16.msra.mxu3 %v1991_v8  ;;  %v2119_v24 = vor.u32 %v2579_v22, %v2118_v21  ;;  %v2183_v27 = vor.u32 %v2595_v26, %v2182_v25  ;;  %v2047_v31 = vor.u32 %v2561_v29, %v2046_v28  ;;  %v2110_v33 = vld [vmem:[%s3773_s3 + $0x160] sm:$0xf]  ;;  %v2593_v38 = vld [vmem:[%s3773_s3 + $0x1e4] sm:$0xf0]  ;;  %v2038_v41 = vld [vmem:[%s3773_s3 + $0xd0] sm:$0xf] }
  0x18   :  { %920 = vmatpush.bf16.msra.mxu0 %v2055_v19  ;;  %v1959_v35 = vor.u32 %v2539_v32, %v1958_v30  ;;  %v2174_v37 = vld [vmem:[%s3773_s3 + $0x1e0] sm:$0xf]  ;;  %v2559_v42 = vld [vmem:[%s3773_s3 + $0xd4] sm:$0xf0]  ;;  %v2537_v47 = vld [vmem:[%s3773_s3 + $0x24] sm:$0xf0] }
  0x19   :  { %939 = vmatpush.bf16.msra.mxu1 %v2119_v24  ;;  %958 = vmatpush.bf16.msra.mxu2 %v2183_v27  ;;  %v2175_v40 = vor.u32 %v2593_v38, %v2174_v37  ;;  %v1950_v43 = vld [vmem:[%s3773_s3 + $0x20] sm:$0xf]  ;;  %v2039_v46 = vor.u32 %v2559_v42, %v2038_v41  ;;  %v2102_v48 = vld [vmem:[%s3773_s3 + $0x150] sm:$0xf]  ;;  %v2591_v54 = vld [vmem:[%s3773_s3 + $0x1d4] sm:$0xf0] }
  0x1a   :  { %v2166_v53 = vld [vmem:[%s3773_s3 + $0x1d0] sm:$0xf]  ;;  %v2030_v56 = vld [vmem:[%s3773_s3 + $0xc0] sm:$0xf]  ;;  %v2535_v60 = vld [vmem:[%s3773_s3 + $0x14] sm:$0xf0] }
  0x1b   :  { %902 = vmatpush.bf16.msra.mxu3 %v1983_v11  ;;  %v2167_v55 = vor.u32 %v2591_v54, %v2166_v53  ;;  %v1942_v58 = vld [vmem:[%s3773_s3 + $0x10] sm:$0xf]  ;;  %v2158_v1 = vld [vmem:[%s3773_s3 + $0x1c0] sm:$0xf]  ;;  %v2555_v6 = vld [vmem:[%s3773_s3 + $0xb4] sm:$0xf0] }
  0x1c   :  { %921 = vmatpush.bf16.msra.mxu0 %v2047_v31  ;;  %v1934_v7 = vld [vmem:[%s3773_s3] sm:$0xf]  ;;  %v2533_v11 = vld [vmem:[%s3773_s3 + $0x4] sm:$0xf0]  ;;  %v2086_v12 = vld [vmem:[%s3773_s3 + $0x130] sm:$0xf] }
  0x1d   :  { %1916 = vmatmul.msk.bf16.gmra.mxu1 %vm85_vm2, %v68_v34  ;;  %v2577_v34 = vld [vmem:[%s3773_s3 + $0x164] sm:$0xf0]  ;;  %959 = vmatpush.bf16.msra.mxu2 %v2175_v40  ;;  %v2571_v13 = vld [vmem:[%s3773_s3 + $0x134] sm:$0xf0]  ;;  %v2150_v17 = vld [vmem:[%s3773_s3 + $0x1b0] sm:$0xf] }
  0x1e   :  { %v2111_v36 = vor.u32 %v2577_v34, %v2110_v33  ;;  %v2087_v16 = vor.u32 %v2571_v13, %v2086_v12  ;;  %v2587_v18 = vld [vmem:[%s3773_s3 + $0x1b4] sm:$0xf0]  ;;  %v2014_v21 = vld [vmem:[%s3773_s3 + $0xa0] sm:$0xf]  ;;  %v2553_v22 = vld [vmem:[%s3773_s3 + $0xa4] sm:$0xf0] }
  0x1f   :  { %903 = vmatpush.bf16.msra.mxu3 %v1975_v14  ;;  %v1935_v14 = vor.u32 %v2533_v11, %v1934_v7  ;;  %v2151_v19 = vor.u32 %v2587_v18, %v2150_v17  ;;  %v2015_v24 = vor.u32 %v2553_v22, %v2014_v21  ;;  %v2569_v25 = vld [vmem:[%s3773_s3 + $0x124] sm:$0xf0]  ;;  %v2142_v26 = vld [vmem:[%s3773_s3 + $0x1a0] sm:$0xf]  ;;  %v2246_v29 = vld [vmem:[%s3773_s3 + $0x270] sm:$0xf] }
  0x20   :  { %1924 = vmatmul.msk.bf16.vlgmr.msrb.gmra.mxu0 %vm85_vm2, %v226_v49  ;;  %1921 = vmatmul.msk.bf16.vlgmr.msrb.gmra.mxu3 %vm85_vm2, %v185_v51  ;;  %v2575_v49 = vld [vmem:[%s3773_s3 + $0x154] sm:$0xf0]  ;;  %v1951_v51 = vor.u32 %v2537_v47, %v1950_v43  ;;  %v2585_v28 = vld [vmem:[%s3773_s3 + $0x1a4] sm:$0xf0]  ;;  %v2006_v34 = vld [vmem:[%s3773_s3 + $0x90] sm:$0xf] }
  0x21   :  { %1919 = vmatmul.msk.bf16.gmra.mxu2 %vm85_vm2, %v147_v50  ;;  %940 = vmatpush.bf16.msra.mxu1 %v2111_v36  ;;  %v2103_v52 = vor.u32 %v2575_v49, %v2102_v48  ;;  %v2611_v30 = vld [vmem:[%s3773_s3 + $0x274] sm:$0xf0]  ;;  %v2143_v32 = vor.u32 %v2585_v28, %v2142_v26  ;;  %v2070_v36 = vld [vmem:[%s3773_s3 + $0x110] sm:$0xf]  ;;  %v2238_v48 = vld [vmem:[%s3773_s3 + $0x260] sm:$0xf] }
  0x22   :  { %922 = vmatpush.bf16.msra.mxu0 %v2039_v46  ;;  %960 = vmatpush.bf16.msra.mxu2 %v2167_v55  ;;  %v2247_v33 = vor.u32 %v2611_v30, %v2246_v29  ;;  %v2567_v41 = vld [vmem:[%s3773_s3 + $0x114] sm:$0xf0]  ;;  %v2134_v42 = vld [vmem:[%s3773_s3 + $0x190] sm:$0xf]  ;;  %v2609_v49 = vld [vmem:[%s3773_s3 + $0x264] sm:$0xf0] }
  0x23   :  { %904 = vmatpush.bf16.msra.mxu3 %v1967_v23  ;;  %v2078_v23 = vld [vmem:[%s3773_s3 + $0x120] sm:$0xf]  ;;  %v2583_v43 = vld [vmem:[%s3773_s3 + $0x194] sm:$0xf0]  ;;  %v2071_v46 = vor.u32 %v2567_v41, %v2070_v36  ;;  %v2549_v55 = vld [vmem:[%s3773_s3 + $0x84] sm:$0xf0] }
  0x24   :  { %v2079_v27 = vor.u32 %v2569_v25, %v2078_v23  ;;  %v2135_v47 = vor.u32 %v2583_v43, %v2134_v42  ;;  %v1998_v54 = vld [vmem:[%s3773_s3 + $0x80] sm:$0xf]  ;;  %v2605_v11 = vld [vmem:[%s3773_s3 + $0x244] sm:$0xf0]  ;;  %v2562_v12 = vld [vmem:[%s3773_s3 + $0xf4] sm:$0xf] }
  0x25   :  { %941 = vmatpush.bf16.msra.mxu1 %v2103_v52  ;;  %v2056_v13 = vld [vmem:[%s3773_s3 + $0xf8] sm:$0xf0]  ;;  %v2578_v17 = vld [vmem:[%s3773_s3 + $0x174] sm:$0xf]  ;;  %v2544_v21 = vld [vmem:[%s3773_s3 + $0x64] sm:$0xf] }
  0x26   :  { %v2120_v18 = vld [vmem:[%s3773_s3 + $0x178] sm:$0xf0]  ;;  %v1984_v22 = vld [vmem:[%s3773_s3 + $0x68] sm:$0xf0]  ;;  %v2214_v23 = vld [vmem:[%s3773_s3 + $0x230] sm:$0xf] }
  0x27   :  { %905 = vmatpush.bf16.msra.mxu3 %v1959_v35  ;;  %v2551_v35 = vld [vmem:[%s3773_s3 + $0x94] sm:$0xf0]  ;;  %v2560_v29 = vld [vmem:[%s3773_s3 + $0xe4] sm:$0xf]  ;;  %v2048_v30 = vld [vmem:[%s3773_s3 + $0xe8] sm:$0xf0] }
  0x28   :  { %v2007_v40 = vor.u32 %v2551_v35, %v2006_v34  ;;  %v2603_v28 = vld [vmem:[%s3773_s3 + $0x234] sm:$0xf0]  ;;  %v3165_v36 = vld [vmem:[%s3772_s2] ss:$0 sm:$0xff]  ;;  %v2542_v42 = vld [vmem:[%s3773_s3 + $0x54] sm:$0xf] }
  0x29   :  { %v2206_v43 = vld [vmem:[%s3773_s3 + $0x220] sm:$0xf] }
  0x2b   :  { %906 = vmatpush.bf16.msra.mxu3 %v1951_v51  ;;  %v2239_v51 = vor.u32 %v2609_v49, %v2238_v48  ;;  %v2601_v49 = vld [vmem:[%s3773_s3 + $0x224] sm:$0xf0] }
  0x2d   :  { %1927 = vmatmul.msk.bf16.vlgmr.msrb.gmra.mxu1 %vm85_vm2, %v267_v57  ;;  %v2557_v57 = vld [vmem:[%s3773_s3 + $0xc4] sm:$0xf0] }
  0x2e   :  { %v2031_v59 = vor.u32 %v2557_v57, %v2030_v56  ;;  %v2062_v56 = vld [vmem:[%s3773_s3 + $0x100] sm:$0xf]  ;;  %v1999_v57 = vor.u32 %v2549_v55, %v1998_v54  ;;  %v2574_v55 = vld [vmem:[%s3773_s3 + $0x154] sm:$0xf] }
  0x30   :  { %1925 = vmatmul.msk.bf16.gmra.mxu0 %vm85_vm2, %v229_v61  ;;  %1922 = vmatmul.msk.bf16.gmra.mxu3 %vm85_vm2, %v188_v62  ;;  %v2094_v61 = vld [vmem:[%s3773_s3 + $0x140] sm:$0xf]  ;;  %v2573_v62 = vld [vmem:[%s3773_s3 + $0x144] sm:$0xf0] }
  0x31   :  { %1930 = vmatmul.msk.bf16.vlgmr.msrb.gmra.mxu2 %vm85_vm2, %v308_v63  ;;  %v1943_v63 = vor.u32 %v2535_v60, %v1942_v58  ;;  %v2095_v0 = vor.u32 %v2573_v62, %v2094_v61  ;;  %923 = vmatpush.bf16.msra.mxu0 %v2031_v59  ;;  %v2581_v58 = vld [vmem:[%s3773_s3 + $0x184] sm:$0xf0]  ;;  %v2230_v61 = vld [vmem:[%s3773_s3 + $0x250] sm:$0xf]  ;;  %v2607_v62 = vld [vmem:[%s3773_s3 + $0x254] sm:$0xf0] }
  0x33   :  { %907 = vmatpush.bf16.msra.mxu3 %v1943_v63  ;;  %942 = vmatpush.bf16.msra.mxu1 %v2095_v0  ;;  %v2231_v0 = vor.u32 %v2607_v62, %v2230_v61 }
  0x37   :  { %908 = vmatpush.bf16.msra.mxu3 %v1935_v14  ;;  %943 = vmatpush.bf16.msra.mxu1 %v2087_v16  ;;  %v2059_v16 = vor.u32 %v2562_v12, %v2056_v13 }
  0x3b   :  { %944 = vmatpush.bf16.msra.mxu1 %v2079_v27  ;;  %977 = vmatpush.bf16.msrb.mxu3 %v2247_v33  ;;  %v1987_v27 = vor.u32 %v2544_v21, %v1984_v22  ;;  %v2051_v33 = vor.u32 %v2560_v29, %v2048_v30  ;;  %v2570_v30 = vld [vmem:[%s3773_s3 + $0x134] sm:$0xf] }
  0x3d   :  { %1928 = vmatmul.msk.bf16.gmra.mxu1 %vm85_vm2, %v270_v2  ;;  %v2589_v2 = vld [vmem:[%s3773_s3 + $0x1c4] sm:$0xf0] }
  0x3e   :  { %v2159_v4 = vor.u32 %v2589_v2, %v2158_v1 }
  0x3f   :  { %945 = vmatpush.bf16.msra.mxu1 %v2071_v46  ;;  %978 = vmatpush.bf16.msrb.mxu3 %v2239_v51  ;;  %v2558_v51 = vld [vmem:[%s3773_s3 + $0xd4] sm:$0xf] }
  0x40   :  { %961 = vmatpush.bf16.msra.mxu2 %v2159_v4  ;;  %v2546_v4 = vld [vmem:[%s3773_s3 + $0x74] sm:$0xf] }
  0x41   :  { %1931 = vmatmul.msk.bf16.gmra.mxu2 %vm85_vm2, %v311_v5  ;;  %v2022_v5 = vld [vmem:[%s3773_s3 + $0xb0] sm:$0xf] }
  0x42   :  { %v2023_v10 = vor.u32 %v2555_v6, %v2022_v5  ;;  %v1992_v5 = vld [vmem:[%s3773_s3 + $0x78] sm:$0xf0]  ;;  %v2222_v6 = vld [vmem:[%s3773_s3 + $0x240] sm:$0xf] }
  0x43   :  { %979 = vmatpush.bf16.msrb.mxu3 %v2231_v0  ;;  %v2223_v14 = vor.u32 %v2605_v11, %v2222_v6  ;;  %v2556_v0 = vld [vmem:[%s3773_s3 + $0xc4] sm:$0xf] }
  0x44   :  { %924 = vmatpush.bf16.msra.mxu0 %v2023_v10  ;;  %962 = vmatpush.bf16.msra.mxu2 %v2151_v19  ;;  %v2123_v19 = vor.u32 %v2578_v17, %v2120_v18  ;;  %v1960_v17 = vld [vmem:[%s3773_s3 + $0x38] sm:$0xf0]  ;;  %v2190_v18 = vld [vmem:[%s3773_s3 + $0x200] sm:$0xf] }
  0x47   :  { %980 = vmatpush.bf16.msrb.mxu3 %v2223_v14 }
  0x48   :  { %925 = vmatpush.bf16.msra.mxu0 %v2015_v24  ;;  %963 = vmatpush.bf16.msra.mxu2 %v2143_v32  ;;  %v2215_v32 = vor.u32 %v2603_v28, %v2214_v23  ;;  %v2597_v23 = vld [vmem:[%s3773_s3 + $0x204] sm:$0xf0] }
  0x49   :  { %v2191_v28 = vor.u32 %v2597_v23, %v2190_v18  ;;  %v2168_v23 = vld [vmem:[%s3773_s3 + $0x1d8] sm:$0xf0] }
  0x4b   :  { %981 = vmatpush.bf16.msrb.mxu3 %v2215_v32  ;;  %v2088_v32 = vld [vmem:[%s3773_s3 + $0x138] sm:$0xf0] }
  0x4c   :  { %926 = vmatpush.bf16.msra.mxu0 %v2007_v40  ;;  %964 = vmatpush.bf16.msra.mxu2 %v2135_v47 }
  0x50   :  { %927 = vmatpush.bf16.msra.mxu0 %v1999_v57 }
  0x8a   :  { %v2892_v15 = vpop.f32.mrf.mxu1 }
  0x8d   :  { %v2966_v50 = vpop.f32.mrf.mxu0 }
  0x8e   :  { %v132_v52 = vadd.f32 %v2892_v15, %v2966_v50  ;;  %v2565_v15 = vld [vmem:[%s3773_s3 + $0x104] sm:$0xf0]  ;;  %v2126_v50 = vld [vmem:[%s3773_s3 + $0x180] sm:$0xf] }
  0x8f   :  { %v2063_v59 = vor.u32 %v2565_v15, %v2062_v56  ;;  %v2127_v60 = vor.u32 %v2581_v58, %v2126_v50  ;;  %v2104_v56 = vld [vmem:[%s3773_s3 + $0x158] sm:$0xf0]  ;;  %v2540_v58 = vld [vmem:[%s3773_s3 + $0x44] sm:$0xf] }
  0x90   :  { %v2107_v50 = vor.u32 %v2574_v55, %v2104_v56  ;;  %v2594_v55 = vld [vmem:[%s3773_s3 + $0x1f4] sm:$0xf]  ;;  %v2184_v56 = vld [vmem:[%s3773_s3 + $0x1f8] sm:$0xf0] }
  0x91   :  { %946 = vmatpush.bf16.msra.mxu1 %v2063_v59  ;;  %965 = vmatpush.bf16.msra.mxu2 %v2127_v60  ;;  %v1968_v59 = vld [vmem:[%s3773_s3 + $0x48] sm:$0xf0]  ;;  %v2198_v60 = vld [vmem:[%s3773_s3 + $0x210] sm:$0xf] }
  0x92   :  { %v2942_v39 = vpop.f32.mrf.mxu1  ;;  %v1971_v62 = vor.u32 %v2540_v58, %v1968_v59  ;;  %v1944_v58 = vld [vmem:[%s3773_s3 + $0x18] sm:$0xf0]  ;;  %v2550_v59 = vld [vmem:[%s3773_s3 + $0x94] sm:$0xf] }
  0x93   :  { %v2953_v44 = vpop.f32.mrf.mxu3 }
  0x94   :  { %v2955_v45 = vpop.f32.mrf.mxu2 }
  0x95   :  { %v3028_v20 = vpop.f32.mrf.mxu0  ;;  %v178_v1 = vadd.f32 %v2955_v45, %v132_v52  ;;  %v1995_v45 = vor.u32 %v2546_v4, %v1992_v5  ;;  %1015 = vmatpush.bf16.msrb.mxu1 %v2059_v16  ;;  %1034 = vmatpush.bf16.msrb.mxu2 %v2123_v19  ;;  %v2040_v52 = vld [vmem:[%s3773_s3 + $0xd8] sm:$0xf0]  ;;  %v2538_v16 = vld [vmem:[%s3773_s3 + $0x34] sm:$0xf] }
  0x96   :  { %v134_v24 = vadd.f32 %v2942_v39, %v3028_v20  ;;  %v2576_v39 = vld [vmem:[%s3773_s3 + $0x164] sm:$0xf]  ;;  %v2112_v20 = vld [vmem:[%s3773_s3 + $0x168] sm:$0xf0]  ;;  %v2043_v54 = vor.u32 %v2558_v51, %v2040_v52  ;;  %v1963_v22 = vor.u32 %v2538_v16, %v1960_v17 }
  0x97   :  { %996 = vmatpush.bf16.msrb.mxu0 %v1995_v45  ;;  %v2080_v51 = vld [vmem:[%s3773_s3 + $0x128] sm:$0xf0]  ;;  %v2564_v17 = vld [vmem:[%s3773_s3 + $0x104] sm:$0xf] }
  0x98   :  { %v2000_v16 = vld [vmem:[%s3773_s3 + $0x88] sm:$0xf0] }
  0x99   :  { %1016 = vmatpush.bf16.msrb.mxu1 %v2051_v33 }
  0x9a   :  { %v2998_v3 = vpop.f32.mrf.mxu1 }
  0x9b   :  { %v3009_v8 = vpop.f32.mrf.mxu3  ;;  %997 = vmatpush.bf16.msrb.mxu0 %v1987_v27  ;;  %v137_v61 = vadd.f32 %v2998_v3, %v2953_v44  ;;  %v2572_v3 = vld [vmem:[%s3773_s3 + $0x144] sm:$0xf] }
  0x9c   :  { %v3011_v9 = vpop.f32.mrf.mxu2 }
  0x9d   :  { %v250_v53 = vpop.f32.mrf.mxu0  ;;  %v179_v34 = vadd.f32 %v3011_v9, %v134_v24  ;;  %v1976_v9 = vld [vmem:[%s3773_s3 + $0x58] sm:$0xf0]  ;;  %1017 = vmatpush.bf16.msrb.mxu1 %v2043_v54  ;;  %v2554_v24 = vld [vmem:[%s3773_s3 + $0xb4] sm:$0xf] }
  0x9e   :  { %v1979_v48 = vor.u32 %v2542_v42, %v1976_v9 }
  0xa0   :  { %998 = vmatpush.bf16.msrb.mxu0 %v1979_v48 }
  0xa2   :  { %v3054_v31 = vpop.f32.mrf.mxu1 }
  0xa3   :  { %v209_v38 = vpop.f32.mrf.mxu3 }
  0xa4   :  { %v3065_v37 = vpop.f32.mrf.mxu2  ;;  %v219_v7 = vadd.f32 %v209_v38, %v178_v1  ;;  %v2115_v38 = vor.u32 %v2576_v39, %v2112_v20  ;;  %v2032_v1 = vld [vmem:[%s3773_s3 + $0xc8] sm:$0xf0]  ;;  %999 = vmatpush.bf16.msrb.mxu0 %v1971_v62  ;;  %v2091_v20 = vor.u32 %v2570_v30, %v2088_v32 }
  0xa5   :  { %v252_v26 = vpop.f32.mrf.mxu0  ;;  %v2035_v44 = vor.u32 %v2556_v0, %v2032_v1  ;;  %v180_v45 = vadd.f32 %v3065_v37, %v137_v61 }
  0xa6   :  { %v260_v25 = vadd.f32 %v250_v53, %v219_v7  ;;  %1035 = vmatpush.bf16.msrb.mxu2 %v2115_v38  ;;  %v2207_v53 = vor.u32 %v2601_v49, %v2206_v43  ;;  %v2096_v7 = vld [vmem:[%s3773_s3 + $0x148] sm:$0xf0] }
  0xa7   :  { %1018 = vmatpush.bf16.msrb.mxu1 %v2035_v44  ;;  %v1952_v38 = vld [vmem:[%s3773_s3 + $0x28] sm:$0xf0] }
  0xa8   :  { %982 = vmatpush.bf16.msrb.mxu3 %v2207_v53  ;;  %1000 = vmatpush.bf16.msrb.mxu0 %v1963_v22  ;;  %v2016_v43 = vld [vmem:[%s3773_s3 + $0xa8] sm:$0xf0]  ;;  %v2590_v22 = vld [vmem:[%s3773_s3 + $0x1d4] sm:$0xf] }
  0xaa   :  { %v291_v63 = vpop.f32.mrf.mxu1  ;;  %1036 = vmatpush.bf16.msrb.mxu2 %v2107_v50  ;;  %v2187_v50 = vor.u32 %v2594_v55, %v2184_v56  ;;  %v2586_v55 = vld [vmem:[%s3773_s3 + $0x1b4] sm:$0xf] }
  0xab   :  { %v211_v10 = vpop.f32.mrf.mxu3  ;;  %v301_v35 = vadd.f32 %v291_v63, %v260_v25  ;;  %v2599_v63 = vld [vmem:[%s3773_s3 + $0x214] sm:$0xf0]  ;;  %v2024_v25 = vld [vmem:[%s3773_s3 + $0xb8] sm:$0xf0] }
  0xac   :  { %v3109_v2 = vpop.f32.mrf.mxu2  ;;  %v220_v46 = vadd.f32 %v211_v10, %v179_v34  ;;  %v2199_v6 = vor.u32 %v2599_v63, %v2198_v60  ;;  %v2099_v10 = vor.u32 %v2572_v3, %v2096_v7  ;;  %v2027_v29 = vor.u32 %v2554_v24, %v2024_v25  ;;  %v2008_v60 = vld [vmem:[%s3773_s3 + $0x98] sm:$0xf0]  ;;  %v2176_v3 = vld [vmem:[%s3773_s3 + $0x1e8] sm:$0xf0]  ;;  %v2532_v7 = vld [vmem:[%s3773_s3 + $0x4] sm:$0xf] }
  0xad   :  { %v255_v13 = vpop.f32.mrf.mxu0  ;;  %v139_v34 = vadd.f32 %v3054_v31, %v3009_v8  ;;  %v2011_v1 = vor.u32 %v2550_v59, %v2008_v60  ;;  %v2584_v60 = vld [vmem:[%s3773_s3 + $0x1a4] sm:$0xf] }
  0xae   :  { %v261_v4 = vadd.f32 %v252_v26, %v220_v46  ;;  %983 = vmatpush.bf16.msrb.mxu3 %v2199_v6  ;;  %1037 = vmatpush.bf16.msrb.mxu2 %v2099_v10  ;;  %v2568_v46 = vld [vmem:[%s3773_s3 + $0x124] sm:$0xf]  ;;  %v1936_v10 = vld [vmem:[%s3773_s3 + $0x8] sm:$0xf0] }
  0xaf   :  { %1019 = vmatpush.bf16.msrb.mxu1 %v2027_v29  ;;  %v2083_v54 = vor.u32 %v2568_v46, %v2080_v51  ;;  %v2592_v6 = vld [vmem:[%s3773_s3 + $0x1e4] sm:$0xf] }
  0xb2   :  { %v293_v40 = vpop.f32.mrf.mxu1  ;;  %984 = vmatpush.bf16.msrb.mxu3 %v2191_v28  ;;  %1038 = vmatpush.bf16.msrb.mxu2 %v2091_v20 }
  0xb3   :  { %v214_v57 = vpop.f32.mrf.mxu3  ;;  %v302_v11 = vadd.f32 %v293_v40, %v261_v4  ;;  %v2552_v40 = vld [vmem:[%s3773_s3 + $0xa4] sm:$0xf]  ;;  %v2566_v4 = vld [vmem:[%s3773_s3 + $0x114] sm:$0xf] }
  0xb4   :  { %v332_v41 = vpop.f32.mrf.mxu2  ;;  %v221_v37 = vadd.f32 %v214_v57, %v180_v45  ;;  %v2019_v49 = vor.u32 %v2552_v40, %v2016_v43 }
  0xb5   :  { %v342_v47 = vadd.f32 %v332_v41, %v301_v35  ;;  %v2536_v35 = vld [vmem:[%s3773_s3 + $0x24] sm:$0xf]  ;;  %v257_v62 = vpop.f32.mrf.mxu0 }
  0xb6   :  { %v262_v42 = vadd.f32 %v255_v13, %v221_v37  ;;  %v1955_v9 = vor.u32 %v2536_v35, %v1952_v38  ;;  %1020 = vmatpush.bf16.msrb.mxu1 %v2019_v49  ;;  %1039 = vmatpush.bf16.msrb.mxu2 %v2083_v54  ;;  %v1939_v13 = vor.u32 %v2532_v7, %v1936_v10  ;;  %v2240_v54 = vld [vmem:[%s3773_s3 + $0x268] sm:$0xf0] }
  0xb7   :  { %v350_v15 = vadd.f32 %v3165_v36, %v342_v47  ;;  %v181_v47 = vadd.f32 %v3109_v2, %v139_v34  ;;  %v2534_v2 = vld [vmem:[%s3773_s3 + $0x14] sm:$0xf] }
  0xb8   :  { %1001 = vmatpush.bf16.msrb.mxu0 %v1955_v9  ;;  %v1947_v0 = vor.u32 %v2534_v2, %v1944_v58  ;;  %v2588_v9 = vld [vmem:[%s3773_s3 + $0x1c4] sm:$0xf]  ;;  %v2152_v2 = vld [vmem:[%s3773_s3 + $0x1b8] sm:$0xf0] }
  0xb9   :  { %v354_v5 = vmax.f32 %v350_v15, 0.0 }
  0xba   :  { %v296_v26 = vpop.f32.mrf.mxu1  ;;  %1021 = vmatpush.bf16.msrb.mxu1 %v2011_v1 }
  0xbb   :  { %v358_v12 = vpack.c.bf16 %v354_v5, %v354_v5  ;;  %v216_v8 = vpop.f32.mrf.mxu3  ;;  %v303_v52 = vadd.f32 %v296_v26, %v262_v42  ;;  %v2072_v5 = vld [vmem:[%s3773_s3 + $0x118] sm:$0xf0] }
  0xbc   :  { %v334_v14 = vpop.f32.mrf.mxu2  ;;  %v222_v57 = vadd.f32 %v216_v8, %v181_v47  ;;  %v2075_v44 = vor.u32 %v2566_v4, %v2072_v5  ;;  %1002 = vmatpush.bf16.msrb.mxu0 %v1947_v0 }
  0xbd   :  { %v366_v19 = vunpack.c.l.b16 %v358_v12  ;;  %v343_v21 = vadd.f32 %v334_v14, %v302_v11  ;;  %v2179_v12 = vor.u32 %v2592_v6, %v2176_v3  ;;  %v2548_v14 = vld [vmem:[%s3773_s3 + $0x84] sm:$0xf]  ;;  %v2136_v3 = vld [vmem:[%s3773_s3 + $0x198] sm:$0xf0] }
  0xbe   :  { %v263_v18 = vadd.f32 %v257_v62, %v222_v57  ;;  %1040 = vmatpush.bf16.msrb.mxu2 %v2075_v44  ;;  %v2606_v57 = vld [vmem:[%s3773_s3 + $0x254] sm:$0xf]  ;;  %v2604_v62 = vld [vmem:[%s3773_s3 + $0x244] sm:$0xf] }
  0xbf   :  { %v3248_v33 = vpack.c.b16 %v366_v19, %v366_v19  ;;  %v351_v39 = vadd.f32 %v3165_v36, %v343_v21  ;;  %v2003_v19 = vor.u32 %v2548_v14, %v2000_v16  ;;  %v2064_v21 = vld [vmem:[%s3773_s3 + $0x108] sm:$0xf0]  ;;  %v2582_v44 = vld [vmem:[%s3773_s3 + $0x194] sm:$0xf] }
  0xc0   :  { %1003 = vmatpush.bf16.msrb.mxu0 %v1939_v13  ;;  %v2067_v35 = vor.u32 %v2564_v17, %v2064_v21  ;;  %v2139_v17 = vor.u32 %v2582_v44, %v2136_v3  ;;  %v2602_v21 = vld [vmem:[%s3773_s3 + $0x234] sm:$0xf]  ;;  %v2621_v44 = vld [vmem:[%s3775_s5 + $0x48] sm:$0xff] }
  0xc1   :  { %v3264_v41 = vsel %vm223_vm5, 0, %v3248_v33  ;;  %v355_v31 = vmax.f32 %v351_v39, 0.0  ;;  %2253 = vmatmul.msk.bf16.vlgmr.msra.gmra.mxu3 %vm3238_vm7, %v3248_v33  ;;  %v2171_v39 = vor.u32 %v2590_v22, %v2168_v23  ;;  %1022 = vmatpush.bf16.msrb.mxu1 %v2003_v19  ;;  %v2216_v22 = vld [vmem:[%s3773_s3 + $0x238] sm:$0xf0]  ;;  %v2580_v23 = vld [vmem:[%s3773_s3 + $0x184] sm:$0xf] }
  0xc2   :  { %v391_v48 = vrot.slane %v3264_v41, 2  ;;  %1053 = vmatpush.bf16.msra.mxu3 %v2187_v50  ;;  %v298_v37 = vpop.f32.mrf.mxu1  ;;  %v399_v26 = vrot.slane %v3264_v41, 4  ;;  %v407_v28 = vrot.slane %v3264_v41, 6  ;;  %v2610_v41 = vld [vmem:[%s3773_s3 + $0x274] sm:$0xf]  ;;  %1041 = vmatpush.bf16.msrb.mxu2 %v2067_v35  ;;  %v2613_v3 = vld [vmem:[%s3775_s5 + $0x8] sm:$0xff] }
  0xc3   :  { %v359_v53 = vpack.c.bf16 %v355_v31, %v355_v31  ;;  %v304_v20 = vadd.f32 %v298_v37, %v263_v18  ;;  %v2248_v31 = vld [vmem:[%s3773_s3 + $0x278] sm:$0xf0]  ;;  %v2192_v35 = vld [vmem:[%s3773_s3 + $0x208] sm:$0xf0] }
  0xc4   :  { %v337_v15 = vpop.f32.mrf.mxu2  ;;  %v2251_v47 = vor.u32 %v2610_v41, %v2248_v31  ;;  %v2232_v50 = vld [vmem:[%s3773_s3 + $0x258] sm:$0xf0] }
  0xc5   :  { %v367_v61 = vunpack.c.l.b16 %v359_v53  ;;  %v344_v63 = vadd.f32 %v337_v15, %v303_v52  ;;  %v2608_v53 = vld [vmem:[%s3773_s3 + $0x264] sm:$0xf]  ;;  %v2155_v15 = vor.u32 %v2586_v55, %v2152_v2  ;;  %v2235_v59 = vor.u32 %v2606_v57, %v2232_v50  ;;  %v2643_v57 = vld [vmem:[%s3775_s5 + $0xf8] sm:$0xff] }
  0xc6   :  { %1054 = vmatpush.bf16.msra.mxu3 %v2179_v12  ;;  %v2624_v55 = vld [vmem:[%s3775_s5 + $0x60] sm:$0xff]  ;;  %v2623_v50 = vld [vmem:[%s3775_s5 + $0x58] sm:$0xff] }
  0xc7   :  { %v3316_v45 = vpack.c.b16 %v367_v61, %v367_v61  ;;  %v352_v11 = vadd.f32 %v3165_v36, %v344_v63  ;;  %v2144_v61 = vld [vmem:[%s3773_s3 + $0x1a8] sm:$0xf0] }
  0xc8   :  { %v2224_v63 = vld [vmem:[%s3773_s3 + $0x248] sm:$0xf0]  ;;  %v2147_v4 = vor.u32 %v2584_v60, %v2144_v61  ;;  %v2642_v60 = vld [vmem:[%s3775_s5 + $0xf0] sm:$0xff] }
  0xc9   :  { %v382_v24 = vsel %vm223_vm5, %v3316_v45, 0  ;;  %v356_v25 = vmax.f32 %v352_v11, 0.0  ;;  %v2227_v6 = vor.u32 %v2604_v62, %v2224_v63  ;;  %v2622_v62 = vld [vmem:[%s3775_s5 + $0x50] sm:$0xff] }
  0xca   :  { %v392_v29 = vrot.slane %v382_v24, 2  ;;  %v400_v30 = vrot.slane %v382_v24, 4  ;;  %v408_v32 = vrot.slane %v382_v24, 6  ;;  %1055 = vmatpush.bf16.msra.mxu3 %v2171_v39  ;;  %v2219_v24 = vor.u32 %v2602_v21, %v2216_v22  ;;  %v2200_v39 = vld [vmem:[%s3773_s3 + $0x218] sm:$0xf0]  ;;  %v2614_v63 = vld [vmem:[%s3775_s5 + $0x10] sm:$0xff] }
  0xcb   :  { %v360_v34 = vpack.c.bf16 %v356_v25, %v356_v25  ;;  %v2128_v25 = vld [vmem:[%s3773_s3 + $0x188] sm:$0xf0]  ;;  %v2630_v21 = vld [vmem:[%s3775_s5 + $0x90] sm:$0xff] }
  0xcc   :  { %v339_v38 = vpop.f32.mrf.mxu2  ;;  %v3342_v40 = vsel %vm141_vm4, %v391_v48, %v392_v29  ;;  %v3345_v42 = vsel %vm223_vm5, %v399_v26, %v400_v30  ;;  %v3348_v8 = vsel %vm92_vm0, %v407_v28, %v408_v32  ;;  %v2160_v48 = vld [vmem:[%s3773_s3 + $0x1c8] sm:$0xf0]  ;;  %v2131_v26 = vor.u32 %v2580_v23, %v2128_v25  ;;  %v2600_v28 = vld [vmem:[%s3773_s3 + $0x224] sm:$0xf]  ;;  %v2598_v32 = vld [vmem:[%s3773_s3 + $0x214] sm:$0xf] }
  0xcd   :  { %v368_v43 = vunpack.c.l.b16 %v360_v34  ;;  %v345_v46 = vadd.f32 %v339_v38, %v304_v20  ;;  %928 = vmatmul.bf16.vlgmr.msra.gmra.mxu0 %v3342_v40  ;;  %947 = vmatmul.bf16.vlgmr.msra.gmra.mxu1 %v3345_v42  ;;  %v2163_v49 = vor.u32 %v2588_v9, %v2160_v48  ;;  %v2208_v29 = vld [vmem:[%s3773_s3 + $0x228] sm:$0xf0]  ;;  %v2203_v20 = vor.u32 %v2598_v32, %v2200_v39  ;;  %v2596_v34 = vld [vmem:[%s3773_s3 + $0x204] sm:$0xf]  ;;  %v2638_v22 = vld [vmem:[%s3775_s5 + $0xd0] sm:$0xff] }
  0xce   :  { %966 = vmatmul.bf16.vlgmr.msra.gmra.mxu2 %v3348_v8  ;;  %1072 = vmatpush.bf16.msra.mxu0 %v2251_v47  ;;  %v2211_v30 = vor.u32 %v2600_v28, %v2208_v29  ;;  %v2195_v38 = vor.u32 %v2596_v34, %v2192_v35  ;;  %v2618_v47 = vld [vmem:[%s3775_s5 + $0x30] sm:$0xff]  ;;  %v2651_v23 = vld [vmem:[%s3775_s5 + $0x138] sm:$0xff]  ;;  %v2637_v28 = vld [vmem:[%s3775_s5 + $0xc8] sm:$0xff] }
  0xcf   :  { %v353_v51 = vadd.f32 %v3165_v36, %v345_v46  ;;  %v3366_v52 = vpack.c.b16 %v368_v43, %v368_v43  ;;  %v2243_v36 = vor.u32 %v2608_v53, %v2240_v54  ;;  %1056 = vmatpush.bf16.msra.mxu3 %v2163_v49  ;;  %v2626_v46 = vld [vmem:[%s3775_s5 + $0x70] sm:$0xff]  ;;  %v2657_v35 = vld [vmem:[%s3775_s5 + $0x168] sm:$0xff] }
  0xd0   :  { %v2658_v25 = vld [vmem:[%s3775_s5 + $0x170] sm:$0xff] }
  0xd1   :  { %v357_v56 = vmax.f32 %v353_v51, 0.0  ;;  %2255 = vmatmul.msk.bf16.gmra.mxu3 %vm3238_vm7, %v3366_v52  ;;  %v379_v1 = vsel %vm223_vm5, 0, %v3366_v52  ;;  %v2625_v51 = vld [vmem:[%s3775_s5 + $0x68] sm:$0xff] }
  0xd2   :  { %1073 = vmatpush.bf16.msra.mxu0 %v2243_v36  ;;  %v394_v10 = vrot.slane %v379_v1, 2  ;;  %v402_v11 = vrot.slane %v379_v1, 4  ;;  %v410_v12 = vrot.slane %v379_v1, 6  ;;  %v2635_v36 = vld [vmem:[%s3775_s5 + $0xb8] sm:$0xff] }
  0xd3   :  { %v361_v58 = vpack.c.bf16 %v357_v56, %v357_v56  ;;  %1057 = vmatpush.bf16.msra.mxu3 %v2155_v15  ;;  %v2616_v56 = vld [vmem:[%s3775_s5 + $0x20] sm:$0xff] }
  0xd5   :  { %v369_v0 = vunpack.c.l.b16 %v361_v58  ;;  %v2615_v58 = vld [vmem:[%s3775_s5 + $0x18] sm:$0xff] }
  0xd6   :  { %1074 = vmatpush.bf16.msra.mxu0 %v2235_v59  ;;  %v2634_v59 = vld [vmem:[%s3775_s5 + $0xb0] sm:$0xff] }
  0xd7   :  { %v373_v5 = vpack.c.b16 %v369_v0, %v369_v0  ;;  %1058 = vmatpush.bf16.msra.mxu3 %v2147_v4  ;;  %v2633_v0 = vld [vmem:[%s3775_s5 + $0xa8] sm:$0xff] }
  0xd9   :  { %v385_v7 = vsel %vm223_vm5, %v373_v5, 0 }
  0xda   :  { %v395_v13 = vrot.slane %v385_v7, 2  ;;  %v403_v14 = vrot.slane %v385_v7, 4  ;;  %v411_v16 = vrot.slane %v385_v7, 6  ;;  %1075 = vmatpush.bf16.msra.mxu0 %v2227_v6  ;;  %v2632_v7 = vld [vmem:[%s3775_s5 + $0xa0] sm:$0xff] }
  0xdb   :  { %1059 = vmatpush.bf16.msra.mxu3 %v2139_v17 }
  0xdc   :  { %v396_v18 = vsel %vm141_vm4, %v394_v10, %v395_v13  ;;  %v404_v37 = vsel %vm223_vm5, %v402_v11, %v403_v14  ;;  %v412_v19 = vsel %vm92_vm0, %v410_v12, %v411_v16  ;;  %v2640_v10 = vld [vmem:[%s3775_s5 + $0xe0] sm:$0xff]  ;;  %v2631_v13 = vld [vmem:[%s3775_s5 + $0x98] sm:$0xff] }
  0xdd   :  { %933 = vmatmul.bf16.gmra.mxu0 %v396_v18  ;;  %952 = vmatmul.bf16.gmra.mxu1 %v404_v37  ;;  %v2620_v11 = vld [vmem:[%s3775_s5 + $0x40] sm:$0xff]  ;;  %v2639_v16 = vld [vmem:[%s3775_s5 + $0xd8] sm:$0xff] }
  0xde   :  { %971 = vmatmul.bf16.gmra.mxu2 %v412_v19  ;;  %1076 = vmatpush.bf16.msra.mxu0 %v2219_v24  ;;  %v2612_v12 = vld [vmem:[%s3775_s5] sm:$0xff] }
  0xdf   :  { %1060 = vmatpush.bf16.msra.mxu3 %v2131_v26  ;;  %v495_v24 = vld [vmem:[%s3774_s4] sm:$0x3]  ;;  %v2629_v26 = vld [vmem:[%s3775_s5 + $0x88] sm:$0xff] }
  0xe0   :  { %v3603_v32 = vperm.slane %v495_v24, 0 }
  0xe1   :  { %2256 = vmatmul.msk.bf16.vlgmr.msrb.gmra.mxu3 %vm223_vm5, %v3316_v45 }
  0xe2   :  { %1077 = vmatpush.bf16.msra.mxu0 %v2211_v30  ;;  %v2650_v30 = vld [vmem:[%s3775_s5 + $0x130] sm:$0xff] }
  0xe3   :  { %1597 = vmatpush.bf16.msrb.mxu3 %v2635_v36 }
  0xe6   :  { %1078 = vmatpush.bf16.msra.mxu0 %v2203_v20  ;;  %v3607_v20 = vperm.slane %v495_v24, 1 }
  0xe7   :  { %1598 = vmatpush.bf16.msrb.mxu3 %v2634_v59 }
  0xea   :  { %1079 = vmatpush.bf16.msra.mxu0 %v2195_v38  ;;  %v2628_v38 = vld [vmem:[%s3775_s5 + $0x80] sm:$0xff] }
  0xeb   :  { %1599 = vmatpush.bf16.msrb.mxu3 %v2633_v0 }
  0xed   :  { %2259 = vmatmul.msk.bf16.vlgmr.msrb.gmra.mxu0 %vm3238_vm7, %v3248_v33  ;;  %1023 = vmatmul.bf16.vlgmr.msrb.gmra.mxu1 %v3342_v40 }
  0xee   :  { %1042 = vmatmul.bf16.vlgmr.msrb.gmra.mxu2 %v3345_v42  ;;  %1616 = vmatpush.bf16.msrb.mxu0 %v2643_v57 }
  0xef   :  { %1600 = vmatpush.bf16.msrb.mxu3 %v2632_v7 }
  0xf1   :  { %2257 = vmatmul.msk.bf16.gmra.mxu3 %vm223_vm5, %v373_v5 }
  0xf2   :  { %1617 = vmatpush.bf16.msrb.mxu0 %v2642_v60 }
  0xf3   :  { %1601 = vmatpush.bf16.msrb.mxu3 %v2631_v13 }
  0xf7   :  { %1602 = vmatpush.bf16.msrb.mxu3 %v2630_v21 }
  0xfb   :  { %1603 = vmatpush.bf16.msrb.mxu3 %v2629_v26 }
  0xfd   :  { %2261 = vmatmul.msk.bf16.gmra.mxu0 %vm3238_vm7, %v3366_v52  ;;  %1028 = vmatmul.bf16.gmra.mxu1 %v396_v18  ;;  %v2617_v52 = vld [vmem:[%s3775_s5 + $0x28] sm:$0xff] }
  0xfe   :  { %1047 = vmatmul.bf16.gmra.mxu2 %v404_v37 }
  0xff   :  { %1604 = vmatpush.bf16.msrb.mxu3 %v2628_v38 }
 0x101   :  { %1061 = vmatmul.bf16.vlgmr.msra.gmra.mxu3 %v3348_v8  ;;  %v2627_v8 = vld [vmem:[%s3775_s5 + $0x78] sm:$0xff] }
 0x102   :  { %1578 = vmatpush.bf16.msra.mxu2 %v2627_v8  ;;  %v2636_v8 = vld [vmem:[%s3775_s5 + $0xc0] sm:$0xff] }
 0x106   :  { %1579 = vmatpush.bf16.msra.mxu2 %v2626_v46  ;;  %v2649_v46 = vld [vmem:[%s3775_s5 + $0x128] sm:$0xff] }
 0x10a   :  { %1580 = vmatpush.bf16.msra.mxu2 %v2625_v51 }
 0x10d   :  { %2262 = vmatmul.msk.bf16.vlgmr.msra.gmra.mxu0 %vm223_vm5, %v3316_v45  ;;  %v2619_v45 = vld [vmem:[%s3775_s5 + $0x38] sm:$0xff] }
 0x10e   :  { %1559 = vmatpush.bf16.msra.mxu1 %v2619_v45  ;;  %1581 = vmatpush.bf16.msra.mxu2 %v2624_v55  ;;  %v2656_v55 = vld [vmem:[%s3775_s5 + $0x160] sm:$0xff] }
 0x111   :  { %1066 = vmatmul.bf16.gmra.mxu3 %v412_v19  ;;  %v2659_v19 = vld [vmem:[%s3775_s5 + $0x178] sm:$0xff] }
 0x112   :  { %1560 = vmatpush.bf16.msra.mxu1 %v2618_v47  ;;  %1582 = vmatpush.bf16.msra.mxu2 %v2623_v50 }
 0x116   :  { %1561 = vmatpush.bf16.msra.mxu1 %v2617_v52  ;;  %1583 = vmatpush.bf16.msra.mxu2 %v2622_v62 }
 0x11a   :  { %1562 = vmatpush.bf16.msra.mxu1 %v2616_v56  ;;  %1584 = vmatpush.bf16.msra.mxu2 %v2621_v44  ;;  %v2648_v56 = vld [vmem:[%s3775_s5 + $0x120] sm:$0xff] }
 0x11d   :  { %2263 = vmatmul.msk.bf16.gmra.mxu0 %vm223_vm5, %v373_v5  ;;  %v2641_v5 = vld [vmem:[%s3775_s5 + $0xe8] sm:$0xff] }
 0x11e   :  { %1563 = vmatpush.bf16.msra.mxu1 %v2615_v58  ;;  %1618 = vmatpush.bf16.msrb.mxu0 %v2641_v5  ;;  %v2647_v58 = vld [vmem:[%s3775_s5 + $0x118] sm:$0xff] }
 0x11f   :  { %1585 = vmatpush.bf16.msra.mxu2 %v2620_v11 }
 0x122   :  { %1564 = vmatpush.bf16.msra.mxu1 %v2614_v63  ;;  %1619 = vmatpush.bf16.msrb.mxu0 %v2640_v10 }
 0x123   :  { %1654 = vmatpush.bf16.msrb.mxu2 %v2659_v19 }
 0x126   :  { %1565 = vmatpush.bf16.msra.mxu1 %v2613_v3  ;;  %1620 = vmatpush.bf16.msrb.mxu0 %v2639_v16  ;;  %v2654_v3 = vld [vmem:[%s3775_s5 + $0x150] sm:$0xff] }
 0x127   :  { %1655 = vmatpush.bf16.msrb.mxu2 %v2658_v25 }
 0x12a   :  { %1566 = vmatpush.bf16.msra.mxu1 %v2612_v12  ;;  %1621 = vmatpush.bf16.msrb.mxu0 %v2638_v22 }
 0x12b   :  { %1656 = vmatpush.bf16.msrb.mxu2 %v2657_v35 }
 0x12e   :  { %1635 = vmatpush.bf16.msrb.mxu1 %v2651_v23  ;;  %1622 = vmatpush.bf16.msrb.mxu0 %v2637_v28 }
 0x12f   :  { %1657 = vmatpush.bf16.msrb.mxu2 %v2656_v55 }
 0x132   :  { %1636 = vmatpush.bf16.msrb.mxu1 %v2650_v30  ;;  %1623 = vmatpush.bf16.msrb.mxu0 %v2636_v8 }
 0x136   :  { %1637 = vmatpush.bf16.msrb.mxu1 %v2649_v46 }
 0x13a   :  { %1638 = vmatpush.bf16.msrb.mxu1 %v2648_v56 }
 0x13e   :  { %1639 = vmatpush.bf16.msrb.mxu1 %v2647_v58 }
 0x144   :  { %v3458_v33 = vpop.f32.mrf.mxu3 }
 0x145   :  { %v911_v47 = vadd.f32 %v3458_v33, %v3603_v32 }
 0x14a   :  { %v3460_v40 = vpop.f32.mrf.mxu0  ;;  %v3468_v9 = vpop.f32.mrf.mxu1 }
 0x14b   :  { %v930_v51 = vadd.f32 %v3460_v40, %v911_v47  ;;  %v2655_v40 = vld [vmem:[%s3775_s5 + $0x158] sm:$0xff] }
 0x14c   :  { %v3462_v42 = vpop.f32.mrf.mxu3  ;;  %1658 = vmatpush.bf16.msrb.mxu2 %v2655_v40 }
 0x14d   :  { %v949_v57 = vadd.f32 %v3468_v9, %v930_v51  ;;  %v913_v59 = vadd.f32 %v3462_v42, %v3603_v32  ;;  %v2646_v42 = vld [vmem:[%s3775_s5 + $0x110] sm:$0xff] }
 0x14e   :  { %1640 = vmatpush.bf16.msrb.mxu1 %v2646_v42 }
 0x150   :  { %1659 = vmatpush.bf16.msrb.mxu2 %v2654_v3 }
 0x151   :  { %v3476_v43 = vpop.f32.mrf.mxu2 }
 0x152   :  { %v3464_v41 = vpop.f32.mrf.mxu0  ;;  %v3494_v53 = vpop.f32.mrf.mxu1  ;;  %v968_v60 = vadd.f32 %v3476_v43, %v949_v57 }
 0x153   :  { %v932_v9 = vadd.f32 %v3464_v41, %v913_v59  ;;  %v2653_v41 = vld [vmem:[%s3775_s5 + $0x148] sm:$0xff] }
 0x154   :  { %v3466_v31 = vpop.f32.mrf.mxu3  ;;  %1660 = vmatpush.bf16.msrb.mxu2 %v2653_v41 }
 0x155   :  { %v916_v16 = vadd.f32 %v3466_v31, %v3603_v32  ;;  %v2652_v31 = vld [vmem:[%s3775_s5 + $0x140] sm:$0xff] }
 0x158   :  { %1661 = vmatpush.bf16.msrb.mxu2 %v2652_v31 }
 0x159   :  { %v3496_v54 = vpop.f32.mrf.mxu2 }
 0x15a   :  { %v3484_v48 = vpop.f32.mrf.mxu0  ;;  %v3526_v61 = vpop.f32.mrf.mxu1 }
 0x15b   :  { %v935_v23 = vadd.f32 %v3484_v48, %v916_v16  ;;  %v2644_v48 = vld [vmem:[%s3775_s5 + $0x100] sm:$0xff] }
 0x15c   :  { %v3486_v49 = vpop.f32.mrf.mxu3 }
 0x15d   :  { %v918_v51 = vadd.f32 %v3486_v49, %v3603_v32 }
 0x161   :  { %v3537_v1 = vpop.f32.mrf.mxu2 }
 0x162   :  { %v3507_v2 = vpop.f32.mrf.mxu0  ;;  %v3568_v17 = vpop.f32.mrf.mxu1 }
 0x164   :  { %v3512_v15 = vpop.f32.mrf.mxu3 }
 0x169   :  { %v3570_v18 = vpop.f32.mrf.mxu2 }
 0x16a   :  { %v1005_v4 = vpop.f32.mrf.mxu0  ;;  %v1024_v34 = vpop.f32.mrf.mxu1 }
 0x16b   :  { %v1006_v52 = vadd.f32 %v1005_v4, %v3607_v20  ;;  %v987_v4 = vadd.f32 %v3512_v15, %v968_v60  ;;  %v951_v15 = vadd.f32 %v3494_v53, %v932_v9 }
 0x16c   :  { %v3542_v6 = vpop.f32.mrf.mxu3 }
 0x16d   :  { %v1025_v50 = vadd.f32 %v1024_v34, %v1006_v52  ;;  %v1091_v11 = vmax.f32 %v987_v4, 0.0  ;;  %v970_v19 = vadd.f32 %v3496_v54, %v951_v15 }
 0x16f   :  { %v989_v53 = vadd.f32 %v3542_v6, %v970_v19 }
 0x171   :  { %v1043_v45 = vpop.f32.mrf.mxu2 }
 0x172   :  { %v1007_v14 = vpop.f32.mrf.mxu0  ;;  %v1044_v62 = vadd.f32 %v1043_v45, %v1025_v50  ;;  %v1026_v63 = vpop.f32.mrf.mxu1  ;;  %v1093_v45 = vmax.f32 %v989_v53, 0.0 }
 0x173   :  { %v1008_v5 = vadd.f32 %v1007_v14, %v3607_v20  ;;  %v2645_v14 = vld [vmem:[%s3775_s5 + $0x108] sm:$0xff] }
 0x174   :  { %v3572_v37 = vpop.f32.mrf.mxu3  ;;  %1641 = vmatpush.bf16.msrb.mxu1 %v2645_v14 }
 0x175   :  { %v1027_v12 = vadd.f32 %v1026_v63, %v1008_v5 }
 0x178   :  { %1642 = vmatpush.bf16.msrb.mxu1 %v2644_v48 }
 0x179   :  { %v1045_v0 = vpop.f32.mrf.mxu2 }
 0x17a   :  { %v3598_v29 = vpop.f32.mrf.mxu0  ;;  %v1046_v21 = vadd.f32 %v1045_v0, %v1027_v12  ;;  %v1029_v25 = vpop.f32.mrf.mxu1 }
 0x17b   :  { %v1011_v24 = vadd.f32 %v3598_v29, %v3607_v20  ;;  %v954_v29 = vadd.f32 %v3526_v61, %v935_v23  ;;  %v937_v61 = vadd.f32 %v3507_v2, %v918_v51 }
 0x17c   :  { %v3605_v39 = vpop.f32.mrf.mxu3 }
 0x17d   :  { %v1030_v46 = vadd.f32 %v1029_v25, %v1011_v24  ;;  %v973_v52 = vadd.f32 %v3537_v1, %v954_v29  ;;  %v956_v63 = vadd.f32 %v3568_v17, %v937_v61 }
 0x181   :  { %v1048_v54 = vpop.f32.mrf.mxu2 }
 0x182   :  { %v3631_v36 = vpop.f32.mrf.mxu0  ;;  %v1049_v55 = vadd.f32 %v1048_v54, %v1030_v46  ;;  %v1031_v2 = vpop.f32.mrf.mxu1 }
 0x183   :  { %v1013_v57 = vadd.f32 %v3631_v36, %v3607_v20 }
 0x184   :  { %v1062_v33 = vpop.f32.mrf.mxu3 }
 0x185   :  { %v1063_v44 = vadd.f32 %v1062_v33, %v1044_v62  ;;  %v992_v33 = vadd.f32 %v3572_v37, %v973_v52  ;;  %v1032_v37 = vadd.f32 %v1031_v2, %v1013_v57  ;;  %v2664_v2 = vld [vmem:[%s3777_s7 + $0x20] sm:$0xff] }
 0x187   :  { %v1095_v9 = vmax.f32 %v992_v33, 0.0  ;;  %v2681_v33 = vld [vmem:[%s3776_s6] ss:$0 sm:$0xff] }
 0x189   :  { %v1050_v0 = vpop.f32.mrf.mxu2 }
 0x18a   :  { %v1081_v43 = vpop.f32.mrf.mxu0  ;;  %v1051_v41 = vadd.f32 %v1050_v0, %v1032_v37 }
 0x18b   :  { %v1082_v7 = vadd.f32 %v1081_v43, %v1063_v44 }
 0x18c   :  { %v1064_v10 = vpop.f32.mrf.mxu3 }
 0x18d   :  { %v1092_v13 = vmax.f32 %v1082_v7, 0.0  ;;  %v1065_v30 = vadd.f32 %v1064_v10, %v1046_v21  ;;  %v975_v7 = vadd.f32 %v3570_v18, %v956_v63 }
 0x18f   :  { %v1099_v22 = vpack.c.bf16 %v1092_v13, %v1091_v11  ;;  %v994_v11 = vadd.f32 %v3605_v39, %v975_v7  ;;  %v2662_v7 = vld [vmem:[%s3777_s7 + $0x10] sm:$0xff] }
 0x191   :  { %v1107_v26 = vunpack.c.l.b16 %v1099_v22  ;;  %v1108_v28 = vunpack.c.h.b16 %v1099_v22  ;;  %v1097_v23 = vmax.f32 %v994_v11, 0.0 }
 0x192   :  { %v1083_v34 = vpop.f32.mrf.mxu0 }
 0x193   :  { %v1115_v35 = vpack.c.b16 %v1107_v26, %v1107_v26  ;;  %v1116_v6 = vpack.c.b16 %v1108_v28, %v1108_v28  ;;  %v1084_v38 = vadd.f32 %v1083_v34, %v1065_v30 }
 0x194   :  { %v1067_v8 = vpop.f32.mrf.mxu3 }
 0x195   :  { %v1094_v47 = vmax.f32 %v1084_v38, 0.0  ;;  %2457 = vmatmul.msk.bf16.vlgmr.msra.gmra.mxu1 %vm3238_vm7, %v1115_v35  ;;  %2461 = vmatmul.msk.bf16.vlgmr.msra.gmra.mxu2 %vm3238_vm7, %v1116_v6  ;;  %v1068_v58 = vadd.f32 %v1067_v8, %v1049_v55  ;;  %v1124_v59 = vsel %vm223_vm5, 0, %v1115_v35  ;;  %v1127_v49 = vsel %vm223_vm5, 0, %v1116_v6 }
 0x196   :  { %v1155_v5 = vrot.slane %v1124_v59, 4  ;;  %v1158_v44 = vrot.slane %v1127_v49, 4 }
 0x197   :  { %v1100_v56 = vpack.c.bf16 %v1094_v47, %v1093_v45 }
 0x199   :  { %v1109_v50 = vunpack.c.l.b16 %v1100_v56  ;;  %v1110_v40 = vunpack.c.h.b16 %v1100_v56  ;;  %v2667_v56 = vld [vmem:[%s3777_s7 + $0x38] sm:$0xff] }
 0x19a   :  { %v1086_v60 = vpop.f32.mrf.mxu0  ;;  %1783 = vmatpush.bf16.msra.mxu3 %v2667_v56 }
 0x19b   :  { %v1117_v32 = vpack.c.b16 %v1109_v50, %v1109_v50  ;;  %v1118_v1 = vpack.c.b16 %v1110_v40, %v1110_v40  ;;  %v1087_v62 = vadd.f32 %v1086_v60, %v1068_v58  ;;  %v2666_v50 = vld [vmem:[%s3777_s7 + $0x30] sm:$0xff]  ;;  %v2665_v60 = vld [vmem:[%s3777_s7 + $0x28] sm:$0xff] }
 0x19c   :  { %v1069_v43 = vpop.f32.mrf.mxu3 }
 0x19d   :  { %v1136_v4 = vsel %vm223_vm5, %v1117_v32, 0  ;;  %v1139_v20 = vsel %vm223_vm5, %v1118_v1, 0  ;;  %v1096_v36 = vmax.f32 %v1087_v62, 0.0  ;;  %v1070_v12 = vadd.f32 %v1069_v43, %v1051_v41 }
 0x19e   :  { %v1156_v3 = vrot.slane %v1136_v4, 4  ;;  %v1159_v42 = vrot.slane %v1139_v20, 4  ;;  %1784 = vmatpush.bf16.msra.mxu3 %v2666_v50 }
 0x19f   :  { %v1101_v15 = vpack.c.bf16 %v1096_v36, %v1095_v9  ;;  %v2663_v36 = vld [vmem:[%s3777_s7 + $0x18] sm:$0xff] }
 0x1a0   :  { %v1157_v17 = vsel %vm223_vm5, %v1155_v5, %v1156_v3  ;;  %v1160_v10 = vsel %vm223_vm5, %v1158_v44, %v1159_v42 }
 0x1a1   :  { %1605 = vmatmul.bf16.vlgmr.msrb.gmra.mxu3 %v1157_v17  ;;  %1624 = vmatmul.bf16.vlgmr.msrb.gmra.mxu0 %v1160_v10  ;;  %v1111_v13 = vunpack.c.l.b16 %v1101_v15  ;;  %v1112_v14 = vunpack.c.h.b16 %v1101_v15 }
 0x1a2   :  { %v1088_v16 = vpop.f32.mrf.mxu0  ;;  %1785 = vmatpush.bf16.msra.mxu3 %v2665_v60  ;;  %v2671_v60 = vld [vmem:[%s3779_s9 + $0x18] sm:$0xff] }
 0x1a3   :  { %v1089_v19 = vadd.f32 %v1088_v16, %v1070_v12  ;;  %v1119_v21 = vpack.c.b16 %v1111_v13, %v1111_v13  ;;  %v1120_v22 = vpack.c.b16 %v1112_v14, %v1112_v14  ;;  %v2738_v13 = vmov 16.0   ;;  %v2661_v14 = vld [vmem:[%s3777_s7 + $0x8] sm:$0xff] }
 0x1a4   :  { %2684 = vrcp.f32 %v2738_v13  ;;  %v2683_v13 = vld [vmem:[%s3780_s10] ss:$0 sm:$0xff] }
 0x1a5   :  { %v1098_v53 = vmax.f32 %v1089_v19, 0.0  ;;  %2459 = vmatmul.msk.bf16.gmra.mxu1 %vm3238_vm7, %v1119_v21  ;;  %2463 = vmatmul.msk.bf16.gmra.mxu2 %vm3238_vm7, %v1120_v22  ;;  %v1130_v28 = vsel %vm223_vm5, 0, %v1119_v21  ;;  %v1133_v30 = vsel %vm223_vm5, 0, %v1120_v22 }
 0x1a6   :  { %v1161_v34 = vrot.slane %v1130_v28, 4  ;;  %v1164_v35 = vrot.slane %v1133_v30, 4  ;;  %1786 = vmatpush.bf16.msra.mxu3 %v2664_v2 }
 0x1a7   :  { %v1102_v18 = vpack.c.bf16 %v1098_v53, %v1097_v23  ;;  %v2660_v23 = vld [vmem:[%s3777_s7] sm:$0xff] }
 0x1a9   :  { %v1113_v24 = vunpack.c.l.b16 %v1102_v18  ;;  %v1114_v39 = vunpack.c.h.b16 %v1102_v18 }
 0x1aa   :  { %1787 = vmatpush.bf16.msra.mxu3 %v2663_v36 }
 0x1ab   :  { %v1121_v25 = vpack.c.b16 %v1113_v24, %v1113_v24  ;;  %v1122_v26 = vpack.c.b16 %v1114_v39, %v1114_v39 }
 0x1ad   :  { %v1142_v31 = vsel %vm223_vm5, %v1121_v25, 0  ;;  %v1145_v54 = vsel %vm223_vm5, %v1122_v26, 0 }
 0x1ae   :  { %v1162_v48 = vrot.slane %v1142_v31, 4  ;;  %v1165_v6 = vrot.slane %v1145_v54, 4  ;;  %1788 = vmatpush.bf16.msra.mxu3 %v2662_v7  ;;  %v2668_v7 = vld [vmem:[%s3779_s9] sm:$0xff] }
 0x1b0   :  { %v1163_v27 = vsel %vm223_vm5, %v1161_v34, %v1162_v48  ;;  %v1166_v38 = vsel %vm223_vm5, %v1164_v35, %v1165_v6  ;;  %v2675_v48 = vld [vmem:[%s3779_s9 + $0x38] sm:$0xff] }
 0x1b1   :  { %1610 = vmatmul.bf16.gmra.mxu3 %v1163_v27  ;;  %1629 = vmatmul.bf16.gmra.mxu0 %v1166_v38  ;;  %v2674_v27 = vld [vmem:[%s3779_s9 + $0x30] sm:$0xff] }
 0x1b2   :  { %1789 = vmatpush.bf16.msra.mxu3 %v2661_v14  ;;  %1866 = vmatpush.bf16.msra.mxu0 %v2675_v48 }
 0x1b5   :  { %2464 = vmatmul.msk.bf16.vlgmr.msrb.gmra.mxu1 %vm223_vm5, %v1117_v32  ;;  %2466 = vmatmul.msk.bf16.vlgmr.msrb.gmra.mxu2 %vm223_vm5, %v1118_v1 }
 0x1b6   :  { %1790 = vmatpush.bf16.msra.mxu3 %v2660_v23  ;;  %1867 = vmatpush.bf16.msra.mxu0 %v2674_v27 }
 0x1c5   :  { %2465 = vmatmul.msk.bf16.gmra.mxu1 %vm223_vm5, %v1121_v25  ;;  %2467 = vmatmul.msk.bf16.gmra.mxu2 %vm223_vm5, %v1122_v26  ;;  %v2685_v25 = vpop.eup %2684 }
 0x1c6   :  { %v1692_v54 = vmul.f32 16.0, %v2685_v25  ;;  %vm1696_vm8 = vweird.f32 %v2685_v25 }
 0x212   :  { %v1568_v29 = vpop.f32.mrf.mxu1 }
 0x213   :  { %v1569_v59 = vadd.f32 %v2681_v33, %v1568_v29 }
 0x218   :  { %v1587_v8 = vpop.f32.mrf.mxu2 }
 0x219   :  { %v1588_v49 = vadd.f32 %v1587_v8, %v1569_v59 }
 0x21a   :  { %v1570_v45 = vpop.f32.mrf.mxu1 }
 0x21b   :  { %v1571_v32 = vadd.f32 %v2681_v33, %v1570_v45  ;;  %v1693_v45 = vsub.f32 1.0, %v1692_v54 }
 0x21e   :  { %v1625_v61 = vpop.f32.mrf.mxu0 }
 0x220   :  { %v1589_v46 = vpop.f32.mrf.mxu2 }
 0x221   :  { %v1590_v1 = vadd.f32 %v1589_v46, %v1571_v32 }
 0x222   :  { %v1573_v47 = vpop.f32.mrf.mxu1 }
 0x223   :  { %v1574_v10 = vadd.f32 %v2681_v33, %v1573_v47 }
 0x224   :  { %v1606_v51 = vpop.f32.mrf.mxu3 }
 0x225   :  { %v1607_v62 = vadd.f32 %v1606_v51, %v1588_v49  ;;  %v2673_v51 = vld [vmem:[%s3779_s9 + $0x28] sm:$0xff] }
 0x226   :  { %v1627_v63 = vpop.f32.mrf.mxu0  ;;  %1868 = vmatpush.bf16.msra.mxu0 %v2673_v51 }
 0x227   :  { %v1626_v4 = vadd.f32 %v1625_v61, %v1607_v62  ;;  %v1694_v61 = vmul.f32 %v2685_v25, %v1693_v45 }
 0x228   :  { %v1592_v52 = vpop.f32.mrf.mxu2 }
 0x229   :  { %v1593_v16 = vadd.f32 %v1592_v52, %v1574_v10 }
 0x22a   :  { %v1575_v55 = vpop.f32.mrf.mxu1 }
 0x22b   :  { %v1576_v19 = vadd.f32 %v2681_v33, %v1575_v55 }
 0x22c   :  { %v1608_v40 = vpop.f32.mrf.mxu3 }
 0x22d   :  { %v1609_v0 = vadd.f32 %v1608_v40, %v1590_v1 }
 0x22e   :  { %v1630_v15 = vpop.f32.mrf.mxu0 }
 0x22f   :  { %v1628_v44 = vadd.f32 %v1627_v63, %v1609_v0  ;;  %v2670_v63 = vld [vmem:[%s3779_s9 + $0x10] sm:$0xff] }
 0x230   :  { %v1594_v57 = vpop.f32.mrf.mxu2 }
 0x231   :  { %v1595_v53 = vadd.f32 %v1594_v57, %v1576_v19  ;;  %v2672_v57 = vld [vmem:[%s3779_s9 + $0x20] sm:$0xff] }
 0x232   :  { %v1644_v58 = vpop.f32.mrf.mxu1  ;;  %1869 = vmatpush.bf16.msra.mxu0 %v2672_v57 }
 0x233   :  { %v1645_v5 = vadd.f32 %v1644_v58, %v1626_v4  ;;  %v1695_v58 = vadd.f32 %v2685_v25, %v1694_v61 }
 0x234   :  { %v1611_v20 = vpop.f32.mrf.mxu3 }
 0x235   :  { %v1612_v18 = vadd.f32 %v1611_v20, %v1593_v16  ;;  %v1697_v1 = vsel %vm1696_vm8, %v2685_v25, %v1695_v58 }
 0x236   :  { %v1632_v31 = vpop.f32.mrf.mxu0  ;;  %1870 = vmatpush.bf16.msra.mxu0 %v2671_v60 }
 0x237   :  { %v1631_v30 = vadd.f32 %v1630_v15, %v1612_v18 }
 0x238   :  { %v1663_v9 = vpop.f32.mrf.mxu2 }
 0x239   :  { %v1664_v3 = vadd.f32 %v1663_v9, %v1645_v5 }
 0x23a   :  { %v1646_v37 = vpop.f32.mrf.mxu1  ;;  %1871 = vmatpush.bf16.msra.mxu0 %v2670_v63 }
 0x23b   :  { %v1647_v42 = vadd.f32 %v1646_v37, %v1628_v44  ;;  %v1673_v11 = vmax.f32 %v1664_v3, 0.0  ;;  %v2669_v37 = vld [vmem:[%s3779_s9 + $0x8] sm:$0xff] }
 0x23c   :  { %v1613_v22 = vpop.f32.mrf.mxu3 }
 0x23d   :  { %v1614_v26 = vadd.f32 %v1613_v22, %v1595_v53 }
 0x23e   :  { %1872 = vmatpush.bf16.msra.mxu0 %v2669_v37 }
 0x23f   :  { %v1633_v6 = vadd.f32 %v1632_v31, %v1614_v26 }
 0x240   :  { %v1665_v43 = vpop.f32.mrf.mxu2 }
 0x241   :  { %v1666_v41 = vadd.f32 %v1665_v43, %v1647_v42 }
 0x242   :  { %v1649_v17 = vpop.f32.mrf.mxu1  ;;  %1873 = vmatpush.bf16.msra.mxu0 %v2668_v7 }
 0x243   :  { %v1674_v12 = vmax.f32 %v1666_v41, 0.0  ;;  %v1650_v35 = vadd.f32 %v1649_v17, %v1631_v30  ;;  %v2682_v41 = vld [vmem:[%s3778_s8] ss:$0 sm:$0xff]  ;;  %s2740_s8 = smov [#allocation2]  }
 0x244   :  { %s1885_s3 = sshll.u32 %s2740_s8, 4  ;;  %s1886_s3 = int_to_ptr.vmem [resolvable:$true] %s1885_s3 }
 0x245   :  { %v1677_v21 = vadd.f32 %v1674_v12, %v1673_v11 }
 0x247   :  { %v1678_v24 = vrot.slane %v1677_v21, 4 }
 0x248   :  { %v1668_v39 = vpop.f32.mrf.mxu2 }
 0x249   :  { %v1679_v28 = vadd.f32 %v1678_v24, %v1677_v21  ;;  %v1669_v29 = vadd.f32 %v1668_v39, %v1650_v35 }
 0x24a   :  { %v1651_v34 = vpop.f32.mrf.mxu1 }
 0x24b   :  { %v1680_v38 = vrot.slane %v1679_v28, 2  ;;  %v1652_v8 = vadd.f32 %v1651_v34, %v1633_v6  ;;  %v1675_v55 = vmax.f32 %v1669_v29, 0.0 }
 0x24d   :  { %v1681_v52 = vadd.f32 %v1680_v38, %v1679_v28 }
 0x24f   :  { %v1682_v50 = vrot.slane %v1681_v52, 1 }
 0x250   :  { %v1670_v46 = vpop.f32.mrf.mxu2 }
 0x251   :  { %v1671_v47 = vadd.f32 %v1670_v46, %v1652_v8  ;;  %v1683_v49 = vadd.f32 %v1682_v50, %v1681_v52 }
 0x253   :  { %v1676_v56 = vmax.f32 %v1671_v47, 0.0  ;;  %v1698_v9 = vmul.f32 %v1697_v1, %v1683_v49 }
 0x255   :  { %v1684_v33 = vadd.f32 %v1676_v56, %v1675_v55  ;;  %v1706_v20 = vpack.c.bf16 %v1698_v9, %v1698_v9 }
 0x257   :  { %v1685_v40 = vrot.slane %v1684_v33, 4  ;;  %v1730_v44 = vunpack.c.l.b16 %v1706_v20 }
 0x259   :  { %v1686_v59 = vadd.f32 %v1685_v40, %v1684_v33 }
 0x25b   :  { %v1687_v32 = vrot.slane %v1686_v59, 2 }
 0x25d   :  { %v1688_v62 = vadd.f32 %v1687_v32, %v1686_v59 }
 0x25f   :  { %v1689_v2 = vrot.slane %v1688_v62, 1 }
 0x261   :  { %v1690_v0 = vadd.f32 %v1689_v2, %v1688_v62 }
 0x263   :  { %v1699_v4 = vmul.f32 %v1697_v1, %v1690_v0 }
 0x265   :  { %v1707_v36 = vpack.c.bf16 %v1699_v4, %v1699_v4  ;;  %v1703_v5 = vsel %vm1702_vm9, %v1699_v4, %v1698_v9 }
 0x266   :  { %1705 = vst [vmem:[#allocation4] sm:$0x3] %v1703_v5 }
 0x267   :  { %v1731_v3 = vunpack.c.l.b16 %v1707_v36  ;;  %1901 = dma.vmem_to_hbm [thread:$0]  %s1897_s15, 32, %s1899_s18, [#allocation5]  }
 0x269   :  { %v1732_v42 = vsel %vm1702_vm9, %v1731_v3, %v1730_v44 }
 0x26a   :  { %v1733_v43 = vpack.c.b16 %v1732_v42, %v1732_v42 }
 0x26c   :  { %1791 = vmatmul.bf16.vlgmr.msra.gmra.mxu3 %v1733_v43 }
 0x2ef   :  { %v1792_v15 = vpop.f32.mrf.mxu3 }
 0x2f0   :  { %v1793_v17 = vadd.f32 %v2682_v41, %v1792_v15 }
 0x2f2   :  { %v1796_v10 = vmax.f32 %v1793_v17, 0.0 }
 0x2f4   :  { %v1797_v11 = vpack.c.bf16 %v1796_v10, %v1796_v10 }
 0x2f6   :  { %1874 = vmatmul.bf16.vlgmr.msra.gmra.mxu0 %v1797_v11 }
 0x2f7   :  { %v1794_v12 = vpop.f32.mrf.mxu3 }
 0x373   :  { %v1875_v14 = vpop.f32.mrf.mxu0 }
 0x374   :  { %v1876_v16 = vadd.f32 %v2683_v13, %v1875_v14 }
 0x376   :  { %1879 = vst [vmem:[#allocation2] sm:$0x3] %v1876_v16 }
 0x377   :  { %1890 = dma.vmem_to_hbm [thread:$0]  %s1886_s3, 32, %s1888_s0, [#allocation3]  }
 0x37b   :  { %v1877_v19 = vpop.f32.mrf.mxu0 }
 0x37c   :  { %2734 = dma.done.wait [#allocation3], 32  }
 0x37d   :  { %2735 = vsyncadd [#allocation3], 4294967264 }
 0x37e   :  { %2736 = dma.done.wait [#allocation5], 32  }
 0x37f   :  { %2737 = vsyncadd [#allocation5], 4294967264 }
 0x380   :  { %1910 = vsyncpa [#allocation3], 1 }
 0x381   :  { %1911 = vsyncpa [#allocation5], 1 }

</bundles_post_ra>
